<compile_context>
chip_gen: v6e
topology: v6e:2x2x1
jax: 0.10.0
libtpu: 0.0.40
codegen_flags: <defaults>
</compile_context>

<pallas_src>
import functools
import numpy as np
import jax
import jax.numpy as jnp
from jax.experimental import pallas as pl
from jax.experimental.pallas import tpu as pltpu

_EPS = 1e-5


# ---------------------------------------------------------------------------
# Fused kernel.  One (batch, row-tile) grid step runs
#   relu(bn1(conv1_1x1(x))) -> relu(bn2(conv2_3x3(.))) -> bn3(conv3_1x1(.)) [-> relu]
# entirely out of VMEM.  BN scales are folded into the weights offline, so each
# layer is "dot + bias (+ relu)".
#
# Spatial layout: the input tile is the tile's rows plus a 2-row halo top and
# bottom and a 1-column zero pad left/right, flattened to a (P_in, Cin) pixel
# matrix, P_in = (th + 4) * (W + 2).  conv2's 3x3 taps are then 9 contiguous
# slices of length Q = th * (W + 2) at static offsets of that flattened grid
# (the 2 pad columns per row produce junk output pixels, stripped in the
# wrapper together with the final transpose).
# ---------------------------------------------------------------------------
def _fused_block_kernel(x_ref, m_ref, w1_ref, b1_ref, w2_ref, b2_ref,
                        w3_ref, b3_ref, o_ref, h1_ref, *, wp, q, last_relu):
    # conv1 (1x1) + bn1 + relu over every pixel of the halo tile.
    h1 = jnp.dot(x_ref[...], w1_ref[...], preferred_element_type=jnp.float32)
    h1 = jnp.maximum(h1 + b1_ref[...], 0.0)
    # Zero the spatial-padding pixels: conv2 needs zero padding of *h1*, and
    # conv1(0) + bias != 0.  Mask is precomputed per row-tile in the wrapper.
    h1_ref[...] = (h1 * m_ref[...]).astype(h1_ref.dtype)

    # conv2 (3x3, stride 1, pad 1) + bn2 + relu: 9 shifted-slice dots.
    cmid = w2_ref.shape[-1]
    acc = jnp.zeros((q, cmid), jnp.float32)
    for kh in range(3):
        for kw in range(3):
            s = (kh + 1) * wp + kw - 1           # static offset into the grid
            acc = acc + jnp.dot(h1_ref[pl.ds(s, q), :], w2_ref[kh * 3 + kw],
                                preferred_element_type=jnp.float32)
    h2 = jnp.maximum(acc + b2_ref[...], 0.0).astype(jnp.bfloat16)

    # conv3 (1x1) + bn3 (+ relu).
    out = jnp.dot(h2, w3_ref[...], preferred_element_type=jnp.float32) + b3_ref[...]
    if last_relu:
        out = jnp.maximum(out, 0.0)
    o_ref[...] = out.astype(o_ref.dtype)


# --------------------------- tiling heuristics --------------------------------

def _vmem_bytes(th, W, cin, cmid, cout):
    wp = W + 2
    pin = (th + 4) * wp
    q = th * wp
    return (2 * pin * cin * 2           # x block, double-buffered, bf16
            + 2 * q * cout * 2          # out block, double-buffered, bf16
            + pin * cmid * 2            # h1 VMEM scratch (bf16)
            + pin * (cmid + 1) * 4      # conv1 f32 value + mask
            + q * cmid * 6              # conv2 f32 acc + bf16 h2
            + q * cout * 4)             # conv3 f32 value


def _choose_row_tile(B, H, W, cin, cmid, cout, budget=6 * 1024 * 1024):
    divisors = [d for d in range(H, 0, -1) if H % d == 0]
    fitting = [d for d in divisors if _vmem_bytes(d, W, cin, cmid, cout) <= budget]
    if not fitting:
        fitting = [1]
    # Prefer >= 4 parallel grid steps (v7x: 2 TensorCores x >= 2 steps each so
    # double-buffering has something to overlap), otherwise keep the largest
    # fitting tile (fewer steps = less halo recompute / per-step overhead).
    stepped = [d for d in fitting if B * (H // d) >= 4]
    return max(stepped) if stepped else max(fitting)


# --------------------------- forward pass ------------------------------------

def basic_conv2d_3x3_fwd(x_nchw, p, *, last_relu=True):
    """x_nchw: (B, Cin, H, W) f32 -> (B, Cout, H, W) f32 (Cout = planes * 4)."""
    B, Cin, H, W = x_nchw.shape
    Cmid = p['w1'].shape[1]
    Cout = p['w3'].shape[1]
    th = _choose_row_tile(B, H, W, Cin, Cmid, Cout)
    RT = H // th
    wp = W + 2
    pin = (th + 4) * wp
    q = th * wp

    # NCHW -> NHWC, pad H by 2 / W by 1 with zeros, gather per-row-tile halo
    # windows and flatten the pixel grid.  One XLA pass over x.
    xp = jnp.pad(x_nchw.transpose(0, 2, 3, 1), ((0, 0), (2, 2), (1, 1), (0, 0)))
    xh = jnp.stack([xp[:, rt * th: rt * th + th + 4] for rt in range(RT)], axis=1)
    xh = xh.reshape(B, RT, pin, Cin).astype(jnp.bfloat16)

    # Validity mask over the flattened halo grid (1.0 = real image pixel).
    r = np.arange(th + 4)[:, None]
    c = np.arange(wp)[None, :]
    mask = np.stack(
        [((c >= 1) & (c <= W)
          & (rt * th + r - 2 >= 0) & (rt * th + r - 2 < H)).astype(np.float32)
         for rt in range(RT)], axis=0).reshape(RT, pin, 1)
    mask = jnp.asarray(mask)

    param_bytes = sum(int(np.prod(v.shape)) * v.dtype.itemsize for v in p.values())
    cost = pl.CostEstimate(
        flops=2 * B * H * W * (Cin * Cmid + 9 * Cmid * Cmid + Cmid * Cout),
        transcendentals=0,
        bytes_accessed=int(B * RT * pin * Cin * 2 + RT * pin * 4
                           + B * RT * q * Cout * 2 + param_bytes))

    cp = dict(dimension_semantics=("parallel", "parallel"))
    est = _vmem_bytes(th, W, Cin, Cmid, Cout)
    if est > 12 * 1024 * 1024:           # raise scoped-VMEM limit only if needed
        cp["vmem_limit_bytes"] = int(min(64 * 1024 * 1024, 2 * est))

    out = pl.pallas_call(
        functools.partial(_fused_block_kernel, wp=wp, q=q, last_relu=last_relu),
        out_shape=jax.ShapeDtypeStruct((B, RT, q, Cout), jnp.bfloat16),
        grid_spec=pltpu.PrefetchScalarGridSpec(
            num_scalar_prefetch=0,
            grid=(B, RT),
            in_specs=[
                pl.BlockSpec((None, None, pin, Cin), lambda b, rt: (b, rt, 0, 0)),
                pl.BlockSpec((None, pin, 1), lambda b, rt: (rt, 0, 0)),
                pl.BlockSpec((Cin, Cmid), lambda b, rt: (0, 0)),
                pl.BlockSpec((1, Cmid), lambda b, rt: (0, 0)),
                pl.BlockSpec((9, Cmid, Cmid), lambda b, rt: (0, 0, 0)),
                pl.BlockSpec((1, Cmid), lambda b, rt: (0, 0)),
                pl.BlockSpec((Cmid, Cout), lambda b, rt: (0, 0)),
                pl.BlockSpec((1, Cout), lambda b, rt: (0, 0)),
            ],
            out_specs=pl.BlockSpec((None, None, q, Cout),
                                   lambda b, rt: (b, rt, 0, 0)),
            scratch_shapes=[pltpu.VMEM((pin, Cmid), jnp.bfloat16)],
        ),
        compiler_params=pltpu.CompilerParams(**cp),
        cost_estimate=cost,
    )(xh, mask, p['w1'], p['b1'], p['w2'], p['b2'], p['w3'], p['b3'])

    # Strip the junk pad columns; back to NCHW f32 (fuses with the transpose).
    out = out.reshape(B, RT, th, wp, Cout)[:, :, :, 1:W + 1, :]
    return out.reshape(B, H, W, Cout).transpose(0, 3, 1, 2).astype(jnp.float32)


# --------------------------- parameter handling ------------------------------

def init_params(key, inplanes, planes):
    ks = jax.random.split(key, 6)

    def conv_w(k, cin, cout, ksz):
        fan = cin * ksz * ksz
        return jax.random.normal(k, (cout, cin, ksz, ksz), jnp.float32) * np.sqrt(2.0 / fan)

    def bn_p(k, c):
        k1, k2, k3, k4 = jax.random.split(k, 4)
        gamma = 1.0 + 0.1 * jax.random.normal(k1, (c,), jnp.float32)
        beta = 0.1 * jax.random.normal(k2, (c,), jnp.float32)
        mean = 0.1 * jax.random.normal(k3, (c,), jnp.float32)
        var = 0.5 + jax.random.uniform(k4, (c,), jnp.float32)
        return gamma, beta, mean, var

    return {
        'w1': conv_w(ks[0], inplanes, planes, 1),    'bn1': bn_p(ks[1], planes),
        'w2': conv_w(ks[2], planes, planes, 3),      'bn2': bn_p(ks[3], planes),
        'w3': conv_w(ks[4], planes, planes * 4, 1),  'bn3': bn_p(ks[5], planes * 4),
    }


def _fold_bn(w, bn):
    gamma, beta, mean, var = bn
    scale = gamma / jnp.sqrt(var + _EPS)
    return w * scale[:, None, None, None], beta - mean * scale


def pack_params(raw):
    # Fold eval-mode BN into the conv weights; re-layout for the fused kernel.
    w1, b1 = _fold_bn(raw['w1'], raw['bn1'])
    w2, b2 = _fold_bn(raw['w2'], raw['bn2'])
    w3, b3 = _fold_bn(raw['w3'], raw['bn3'])
    cmid = w1.shape[0]
    w2m = jnp.transpose(w2, (2, 3, 1, 0)).reshape(9, cmid, cmid)   # tap = kh*3+kw
    return {
        'w1': jnp.transpose(w1[:, :, 0, 0]).astype(jnp.bfloat16),  # (Cin,  Cmid)
        'b1': b1.reshape(1, -1).astype(jnp.float32),
        'w2': w2m.astype(jnp.bfloat16),                            # (9, Cmid, Cmid)
        'b2': b2.reshape(1, -1).astype(jnp.float32),
        'w3': jnp.transpose(w3[:, :, 0, 0]).astype(jnp.bfloat16),  # (Cmid, Cout)
        'b3': b3.reshape(1, -1).astype(jnp.float32),
    }


# --------------------------- f32 reference (tolerance check) -----------------

def ref_forward(x, raw, last_relu=True):
    def conv(x, w, pad):
        return jax.lax.conv_general_dilated(
            x, w, window_strides=(1, 1), padding=((pad, pad), (pad, pad)),
            dimension_numbers=('NCHW', 'OIHW', 'NCHW'))

    def bn(x, p):
        g, b, m, v = p
        s = g / jnp.sqrt(v + _EPS)
        return x * s[None, :, None, None] + (b - m * s)[None, :, None, None]

    out = jax.nn.relu(bn(conv(x, raw['w1'], 0), raw['bn1']))
    out = jax.nn.relu(bn(conv(out, raw['w2'], 1), raw['bn2']))
    out = bn(conv(out, raw['w3'], 0), raw['bn3'])
    return jax.nn.relu(out) if last_relu else out


# --------------------------- main ---------------------------------------------

if __name__ == "__main__":
    key = jax.random.PRNGKey(0)
    k_param, k_x = jax.random.split(key)

    inplanes, planes = 32, 16          # expansion = 4 -> cout = 64
    B, H, W = 2, 16, 16

    raw = init_params(k_param, inplanes, planes)
    packed = pack_params(raw)
    x = jax.random.normal(k_x, (B, inplanes, H, W), jnp.float32)

    fwd = jax.jit(functools.partial(basic_conv2d_3x3_fwd, last_relu=True))
    out = fwd(x, packed)
    jax.block_until_ready(out)

    assert out.shape == (B, planes * 4, H, W), out.shape
    assert bool(jnp.all(jnp.isfinite(out)))

    # bf16-operand / f32-accumulate fused path vs. pure-f32 XLA reference.
    ref = ref_forward(x, raw, last_relu=True)
    err = float(jnp.max(jnp.abs(out - ref)))
    scale = float(jnp.max(jnp.abs(ref))) + 1e-6
    assert err <= 0.05 * scale + 1e-2, (err, scale)

    print("KERNEL_OK")
</pallas_src>

<mosaic_0001>
module attributes {stable_mosaic.version = 11 : i64} {
  func.func @_fused_block_kernel(%arg0: i32, %arg1: i32, %arg2: memref<1x1x216x32xbf16, #tpu.memory_space<vmem>>, %arg3: memref<1x216x1xf32, #tpu.memory_space<vmem>>, %arg4: memref<32x16xbf16, #tpu.memory_space<vmem>>, %arg5: memref<1x16xf32, #tpu.memory_space<vmem>>, %arg6: memref<9x16x16xbf16, #tpu.memory_space<vmem>>, %arg7: memref<1x16xf32, #tpu.memory_space<vmem>>, %arg8: memref<16x64xbf16, #tpu.memory_space<vmem>>, %arg9: memref<1x64xf32, #tpu.memory_space<vmem>>, %arg10: memref<1x1x144x64xbf16, #tpu.memory_space<vmem>>, %arg11: memref<216x16xbf16, #tpu.memory_space<vmem>>) attributes {dimension_semantics = [#tpu.dimension_semantics<parallel>, #tpu.dimension_semantics<parallel>], iteration_bounds = array<i64: 2, 2>, scalar_prefetch = 0 : i64, scratch_operands = 1 : i64, tpu.core_type = #tpu.core_type<tc>, window_params = [{transform_indices = @transform_0, window_bounds = array<i64: 1, 1, 216, 32>}, {transform_indices = @transform_1, window_bounds = array<i64: 1, 216, 1>}, {pipeline_mode = #tpu.pipeline_mode<synchronous>, transform_indices = @transform_2, window_bounds = array<i64: 32, 16>}, {pipeline_mode = #tpu.pipeline_mode<synchronous>, transform_indices = @transform_3, window_bounds = array<i64: 1, 16>}, {pipeline_mode = #tpu.pipeline_mode<synchronous>, transform_indices = @transform_4, window_bounds = array<i64: 9, 16, 16>}, {pipeline_mode = #tpu.pipeline_mode<synchronous>, transform_indices = @transform_5, window_bounds = array<i64: 1, 16>}, {pipeline_mode = #tpu.pipeline_mode<synchronous>, transform_indices = @transform_6, window_bounds = array<i64: 16, 64>}, {pipeline_mode = #tpu.pipeline_mode<synchronous>, transform_indices = @transform_7, window_bounds = array<i64: 1, 64>}, {transform_indices = @transform_8, window_bounds = array<i64: 1, 1, 144, 64>}]} {
    %c0 = arith.constant 0 : index
    %c0_0 = arith.constant 0 : index
    %c0_1 = arith.constant 0 : index
    %c0_2 = arith.constant 0 : index
    %0 = vector.load %arg2[%c0, %c0_0, %c0_1, %c0_2] : memref<1x1x216x32xbf16, #tpu.memory_space<vmem>>, vector<1x1x216x32xbf16>
    %1 = vector.shape_cast %0 : vector<1x1x216x32xbf16> to vector<216x32xbf16>
    %c0_3 = arith.constant 0 : index
    %c0_4 = arith.constant 0 : index
    %2 = vector.load %arg4[%c0_3, %c0_4] : memref<32x16xbf16, #tpu.memory_space<vmem>>, vector<32x16xbf16>
    %cst = arith.constant dense<0.000000e+00> : vector<216x16xf32>
    %3 = tpu.matmul %1, %2, %cst {dimension_numbers = #tpu.dot_dimension_numbers<[1], [0], [0], [1], [0, 0, 1, 1], [], []>} : vector<216x32xbf16>, vector<32x16xbf16>, vector<216x16xf32> -> vector<216x16xf32>
    %c0_5 = arith.constant 0 : index
    %c0_6 = arith.constant 0 : index
    %4 = vector.load %arg5[%c0_5, %c0_6] : memref<1x16xf32, #tpu.memory_space<vmem>>, vector<1x16xf32>
    %5 = vector.broadcast %4 : vector<1x16xf32> to vector<216x16xf32>
    %6 = arith.addf %3, %5 : vector<216x16xf32>
    %cst_7 = arith.constant 0.000000e+00 : f32
    %7 = vector.broadcast %cst_7 : f32 to vector<216x16xf32>
    %8 = arith.maximumf %6, %7 : vector<216x16xf32>
    %c0_8 = arith.constant 0 : index
    %c0_9 = arith.constant 0 : index
    %c0_10 = arith.constant 0 : index
    %9 = vector.load %arg3[%c0_8, %c0_9, %c0_10] : memref<1x216x1xf32, #tpu.memory_space<vmem>>, vector<1x216x1xf32>
    %10 = vector.shape_cast %9 : vector<1x216x1xf32> to vector<216x1xf32>
    %11 = vector.broadcast %10 : vector<216x1xf32> to vector<216x16xf32>
    %12 = arith.mulf %8, %11 : vector<216x16xf32>
    %13 = arith.truncf %12 : vector<216x16xf32> to vector<216x16xbf16>
    %c0_11 = arith.constant 0 : index
    %c0_12 = arith.constant 0 : index
    %14 = vector.load %arg11[%c0_11, %c0_12] : memref<216x16xbf16, #tpu.memory_space<vmem>>, vector<216x16xbf16>
    tpu.vector_store %arg11[%c0_11, %c0_12], %13 {strides = array<i32>} : memref<216x16xbf16, #tpu.memory_space<vmem>>, vector<216x16xbf16>,
    %cst_13 = arith.constant 0.000000e+00 : f32
    %15 = vector.broadcast %cst_13 : f32 to vector<144x16xf32>
    %c17 = arith.constant 17 : index
    %c0_14 = arith.constant 0 : index
    %16 = vector.load %arg11[%c17, %c0_14] : memref<216x16xbf16, #tpu.memory_space<vmem>>, vector<144x16xbf16>
    %c0_15 = arith.constant 0 : index
    %c0_16 = arith.constant 0 : index
    %c0_17 = arith.constant 0 : index
    %17 = vector.load %arg6[%c0_15, %c0_16, %c0_17] : memref<9x16x16xbf16, #tpu.memory_space<vmem>>, vector<1x16x16xbf16>
    %18 = vector.shape_cast %17 : vector<1x16x16xbf16> to vector<16x16xbf16>
    %cst_18 = arith.constant dense<0.000000e+00> : vector<144x16xf32>
    %19 = tpu.matmul %16, %18, %cst_18 {dimension_numbers = #tpu.dot_dimension_numbers<[1], [0], [0], [1], [0, 0, 1, 1], [], []>} : vector<144x16xbf16>, vector<16x16xbf16>, vector<144x16xf32> -> vector<144x16xf32>
    %20 = arith.addf %15, %19 : vector<144x16xf32>
    %c18 = arith.constant 18 : index
    %c0_19 = arith.constant 0 : index
    %21 = vector.load %arg11[%c18, %c0_19] : memref<216x16xbf16, #tpu.memory_space<vmem>>, vector<144x16xbf16>
    %c1 = arith.constant 1 : index
    %c0_20 = arith.constant 0 : index
    %c0_21 = arith.constant 0 : index
    %22 = vector.load %arg6[%c1, %c0_20, %c0_21] : memref<9x16x16xbf16, #tpu.memory_space<vmem>>, vector<1x16x16xbf16>
    %23 = vector.shape_cast %22 : vector<1x16x16xbf16> to vector<16x16xbf16>
    %cst_22 = arith.constant dense<0.000000e+00> : vector<144x16xf32>
    %24 = tpu.matmul %21, %23, %cst_22 {dimension_numbers = #tpu.dot_dimension_numbers<[1], [0], [0], [1], [0, 0, 1, 1], [], []>} : vector<144x16xbf16>, vector<16x16xbf16>, vector<144x16xf32> -> vector<144x16xf32>
    %25 = arith.addf %20, %24 : vector<144x16xf32>
    %c19 = arith.constant 19 : index
    %c0_23 = arith.constant 0 : index
    %26 = vector.load %arg11[%c19, %c0_23] : memref<216x16xbf16, #tpu.memory_space<vmem>>, vector<144x16xbf16>
    %c2 = arith.constant 2 : index
    %c0_24 = arith.constant 0 : index
    %c0_25 = arith.constant 0 : index
    %27 = vector.load %arg6[%c2, %c0_24, %c0_25] : memref<9x16x16xbf16, #tpu.memory_space<vmem>>, vector<1x16x16xbf16>
    %28 = vector.shape_cast %27 : vector<1x16x16xbf16> to vector<16x16xbf16>
    %cst_26 = arith.constant dense<0.000000e+00> : vector<144x16xf32>
    %29 = tpu.matmul %26, %28, %cst_26 {dimension_numbers = #tpu.dot_dimension_numbers<[1], [0], [0], [1], [0, 0, 1, 1], [], []>} : vector<144x16xbf16>, vector<16x16xbf16>, vector<144x16xf32> -> vector<144x16xf32>
    %30 = arith.addf %25, %29 : vector<144x16xf32>
    %c35 = arith.constant 35 : index
    %c0_27 = arith.constant 0 : index
    %31 = vector.load %arg11[%c35, %c0_27] : memref<216x16xbf16, #tpu.memory_space<vmem>>, vector<144x16xbf16>
    %c3 = arith.constant 3 : index
    %c0_28 = arith.constant 0 : index
    %c0_29 = arith.constant 0 : index
    %32 = vector.load %arg6[%c3, %c0_28, %c0_29] : memref<9x16x16xbf16, #tpu.memory_space<vmem>>, vector<1x16x16xbf16>
    %33 = vector.shape_cast %32 : vector<1x16x16xbf16> to vector<16x16xbf16>
    %cst_30 = arith.constant dense<0.000000e+00> : vector<144x16xf32>
    %34 = tpu.matmul %31, %33, %cst_30 {dimension_numbers = #tpu.dot_dimension_numbers<[1], [0], [0], [1], [0, 0, 1, 1], [], []>} : vector<144x16xbf16>, vector<16x16xbf16>, vector<144x16xf32> -> vector<144x16xf32>
    %35 = arith.addf %30, %34 : vector<144x16xf32>
    %c36 = arith.constant 36 : index
    %c0_31 = arith.constant 0 : index
    %36 = vector.load %arg11[%c36, %c0_31] : memref<216x16xbf16, #tpu.memory_space<vmem>>, vector<144x16xbf16>
    %c4 = arith.constant 4 : index
    %c0_32 = arith.constant 0 : index
    %c0_33 = arith.constant 0 : index
    %37 = vector.load %arg6[%c4, %c0_32, %c0_33] : memref<9x16x16xbf16, #tpu.memory_space<vmem>>, vector<1x16x16xbf16>
    %38 = vector.shape_cast %37 : vector<1x16x16xbf16> to vector<16x16xbf16>
    %cst_34 = arith.constant dense<0.000000e+00> : vector<144x16xf32>
    %39 = tpu.matmul %36, %38, %cst_34 {dimension_numbers = #tpu.dot_dimension_numbers<[1], [0], [0], [1], [0, 0, 1, 1], [], []>} : vector<144x16xbf16>, vector<16x16xbf16>, vector<144x16xf32> -> vector<144x16xf32>
    %40 = arith.addf %35, %39 : vector<144x16xf32>
    %c37 = arith.constant 37 : index
    %c0_35 = arith.constant 0 : index
    %41 = vector.load %arg11[%c37, %c0_35] : memref<216x16xbf16, #tpu.memory_space<vmem>>, vector<144x16xbf16>
    %c5 = arith.constant 5 : index
    %c0_36 = arith.constant 0 : index
    %c0_37 = arith.constant 0 : index
    %42 = vector.load %arg6[%c5, %c0_36, %c0_37] : memref<9x16x16xbf16, #tpu.memory_space<vmem>>, vector<1x16x16xbf16>
    %43 = vector.shape_cast %42 : vector<1x16x16xbf16> to vector<16x16xbf16>
    %cst_38 = arith.constant dense<0.000000e+00> : vector<144x16xf32>
    %44 = tpu.matmul %41, %43, %cst_38 {dimension_numbers = #tpu.dot_dimension_numbers<[1], [0], [0], [1], [0, 0, 1, 1], [], []>} : vector<144x16xbf16>, vector<16x16xbf16>, vector<144x16xf32> -> vector<144x16xf32>
    %45 = arith.addf %40, %44 : vector<144x16xf32>
    %c53 = arith.constant 53 : index
    %c0_39 = arith.constant 0 : index
    %46 = vector.load %arg11[%c53, %c0_39] : memref<216x16xbf16, #tpu.memory_space<vmem>>, vector<144x16xbf16>
    %c6 = arith.constant 6 : index
    %c0_40 = arith.constant 0 : index
    %c0_41 = arith.constant 0 : index
    %47 = vector.load %arg6[%c6, %c0_40, %c0_41] : memref<9x16x16xbf16, #tpu.memory_space<vmem>>, vector<1x16x16xbf16>
    %48 = vector.shape_cast %47 : vector<1x16x16xbf16> to vector<16x16xbf16>
    %cst_42 = arith.constant dense<0.000000e+00> : vector<144x16xf32>
    %49 = tpu.matmul %46, %48, %cst_42 {dimension_numbers = #tpu.dot_dimension_numbers<[1], [0], [0], [1], [0, 0, 1, 1], [], []>} : vector<144x16xbf16>, vector<16x16xbf16>, vector<144x16xf32> -> vector<144x16xf32>
    %50 = arith.addf %45, %49 : vector<144x16xf32>
    %c54 = arith.constant 54 : index
    %c0_43 = arith.constant 0 : index
    %51 = vector.load %arg11[%c54, %c0_43] : memref<216x16xbf16, #tpu.memory_space<vmem>>, vector<144x16xbf16>
    %c7 = arith.constant 7 : index
    %c0_44 = arith.constant 0 : index
    %c0_45 = arith.constant 0 : index
    %52 = vector.load %arg6[%c7, %c0_44, %c0_45] : memref<9x16x16xbf16, #tpu.memory_space<vmem>>, vector<1x16x16xbf16>
    %53 = vector.shape_cast %52 : vector<1x16x16xbf16> to vector<16x16xbf16>
    %cst_46 = arith.constant dense<0.000000e+00> : vector<144x16xf32>
    %54 = tpu.matmul %51, %53, %cst_46 {dimension_numbers = #tpu.dot_dimension_numbers<[1], [0], [0], [1], [0, 0, 1, 1], [], []>} : vector<144x16xbf16>, vector<16x16xbf16>, vector<144x16xf32> -> vector<144x16xf32>
    %55 = arith.addf %50, %54 : vector<144x16xf32>
    %c55 = arith.constant 55 : index
    %c0_47 = arith.constant 0 : index
    %56 = vector.load %arg11[%c55, %c0_47] : memref<216x16xbf16, #tpu.memory_space<vmem>>, vector<144x16xbf16>
    %c8 = arith.constant 8 : index
    %c0_48 = arith.constant 0 : index
    %c0_49 = arith.constant 0 : index
    %57 = vector.load %arg6[%c8, %c0_48, %c0_49] : memref<9x16x16xbf16, #tpu.memory_space<vmem>>, vector<1x16x16xbf16>
    %58 = vector.shape_cast %57 : vector<1x16x16xbf16> to vector<16x16xbf16>
    %cst_50 = arith.constant dense<0.000000e+00> : vector<144x16xf32>
    %59 = tpu.matmul %56, %58, %cst_50 {dimension_numbers = #tpu.dot_dimension_numbers<[1], [0], [0], [1], [0, 0, 1, 1], [], []>} : vector<144x16xbf16>, vector<16x16xbf16>, vector<144x16xf32> -> vector<144x16xf32>
    %60 = arith.addf %55, %59 : vector<144x16xf32>
    %c0_51 = arith.constant 0 : index
    %c0_52 = arith.constant 0 : index
    %61 = vector.load %arg7[%c0_51, %c0_52] : memref<1x16xf32, #tpu.memory_space<vmem>>, vector<1x16xf32>
    %62 = vector.broadcast %61 : vector<1x16xf32> to vector<144x16xf32>
    %63 = arith.addf %60, %62 : vector<144x16xf32>
    %cst_53 = arith.constant 0.000000e+00 : f32
    %64 = vector.broadcast %cst_53 : f32 to vector<144x16xf32>
    %65 = arith.maximumf %63, %64 : vector<144x16xf32>
    %66 = arith.truncf %65 : vector<144x16xf32> to vector<144x16xbf16>
    %c0_54 = arith.constant 0 : index
    %c0_55 = arith.constant 0 : index
    %67 = vector.load %arg8[%c0_54, %c0_55] : memref<16x64xbf16, #tpu.memory_space<vmem>>, vector<16x64xbf16>
    %cst_56 = arith.constant dense<0.000000e+00> : vector<144x64xf32>
    %68 = tpu.matmul %66, %67, %cst_56 {dimension_numbers = #tpu.dot_dimension_numbers<[1], [0], [0], [1], [0, 0, 1, 1], [], []>} : vector<144x16xbf16>, vector<16x64xbf16>, vector<144x64xf32> -> vector<144x64xf32>
    %c0_57 = arith.constant 0 : index
    %c0_58 = arith.constant 0 : index
    %69 = vector.load %arg9[%c0_57, %c0_58] : memref<1x64xf32, #tpu.memory_space<vmem>>, vector<1x64xf32>
    %70 = vector.broadcast %69 : vector<1x64xf32> to vector<144x64xf32>
    %71 = arith.addf %68, %70 : vector<144x64xf32>
    %cst_59 = arith.constant 0.000000e+00 : f32
    %72 = vector.broadcast %cst_59 : f32 to vector<144x64xf32>
    %73 = arith.maximumf %71, %72 : vector<144x64xf32>
    %74 = arith.truncf %73 : vector<144x64xf32> to vector<144x64xbf16>
    %c0_60 = arith.constant 0 : index
    %c0_61 = arith.constant 0 : index
    %c0_62 = arith.constant 0 : index
    %c0_63 = arith.constant 0 : index
    %75 = vector.load %arg10[%c0_60, %c0_61, %c0_62, %c0_63] : memref<1x1x144x64xbf16, #tpu.memory_space<vmem>>, vector<1x1x144x64xbf16>
    %76 = vector.shape_cast %75 : vector<1x1x144x64xbf16> to vector<144x64xbf16>
    %77 = vector.shape_cast %74 : vector<144x64xbf16> to vector<1x1x144x64xbf16>
    tpu.vector_store %arg10[%c0_60, %c0_61, %c0_62, %c0_63], %77 {strides = array<i32>} : memref<1x1x144x64xbf16, #tpu.memory_space<vmem>>, vector<1x1x144x64xbf16>,
    return
  }
  func.func @transform_0(%arg0: i32, %arg1: i32) -> (i32, i32, i32, i32) {
    %c0_i32 = arith.constant 0 : i32
    %c0_i32_0 = arith.constant 0 : i32
    %c0_i32_1 = arith.constant 0 : i32
    return %arg0, %arg1, %c0_i32, %c0_i32_0 : i32, i32, i32, i32
  }
  func.func @transform_1(%arg0: i32, %arg1: i32) -> (i32, i32, i32) {
    %c0_i32 = arith.constant 0 : i32
    %c0_i32_0 = arith.constant 0 : i32
    %c0_i32_1 = arith.constant 0 : i32
    return %arg1, %c0_i32, %c0_i32_0 : i32, i32, i32
  }
  func.func @transform_2(%arg0: i32, %arg1: i32) -> (i32, i32) {
    %c0_i32 = arith.constant 0 : i32
    %c0_i32_0 = arith.constant 0 : i32
    %c0_i32_1 = arith.constant 0 : i32
    return %c0_i32, %c0_i32_0 : i32, i32
  }
  func.func @transform_3(%arg0: i32, %arg1: i32) -> (i32, i32) {
    %c0_i32 = arith.constant 0 : i32
    %c0_i32_0 = arith.constant 0 : i32
    %c0_i32_1 = arith.constant 0 : i32
    return %c0_i32, %c0_i32_0 : i32, i32
  }
  func.func @transform_4(%arg0: i32, %arg1: i32) -> (i32, i32, i32) {
    %c0_i32 = arith.constant 0 : i32
    %c0_i32_0 = arith.constant 0 : i32
    %c0_i32_1 = arith.constant 0 : i32
    %c0_i32_2 = arith.constant 0 : i32
    return %c0_i32, %c0_i32_0, %c0_i32_1 : i32, i32, i32
  }
  func.func @transform_5(%arg0: i32, %arg1: i32) -> (i32, i32) {
    %c0_i32 = arith.constant 0 : i32
    %c0_i32_0 = arith.constant 0 : i32
    %c0_i32_1 = arith.constant 0 : i32
    return %c0_i32, %c0_i32_0 : i32, i32
  }
  func.func @transform_6(%arg0: i32, %arg1: i32) -> (i32, i32) {
    %c0_i32 = arith.constant 0 : i32
    %c0_i32_0 = arith.constant 0 : i32
    %c0_i32_1 = arith.constant 0 : i32
    return %c0_i32, %c0_i32_0 : i32, i32
  }
  func.func @transform_7(%arg0: i32, %arg1: i32) -> (i32, i32) {
    %c0_i32 = arith.constant 0 : i32
    %c0_i32_0 = arith.constant 0 : i32
    %c0_i32_1 = arith.constant 0 : i32
    return %c0_i32, %c0_i32_0 : i32, i32
  }
  func.func @transform_8(%arg0: i32, %arg1: i32) -> (i32, i32, i32, i32) {
    %c0_i32 = arith.constant 0 : i32
    %c0_i32_0 = arith.constant 0 : i32
    %c0_i32_1 = arith.constant 0 : i32
    return %arg0, %arg1, %c0_i32, %c0_i32_0 : i32, i32, i32, i32
  }
}

</mosaic_0001>

<bundles_post_ra>
// kernel: basic_conv2d_3x3_fwd.1
= control target key start
LH: loop header
LB: loop body
LE: loop exit
PB: predicated region body
PF: predicated region fallthrough
CT: control target
= control target key end

     0   :  { %s4538_s27 = smov 0   ;;  %s4540_s28 = smov 0   ;;  %s5854_s0 = inlined_call_operand.vmem [shape: bf16[2,2,216,32], index: 0, kind: input, shape index: {}]   ;;  %s5855_s1 = inlined_call_operand.vmem [shape: f32[2,216,1], index: 1, kind: input, shape index: {}]   ;;  %s5856_s2 = inlined_call_operand.vmem [shape: bf16[32,16], index: 2, kind: input, shape index: {}]   ;;  %s5857_s3 = inlined_call_operand.vmem [shape: f32[1,16], index: 3, kind: input, shape index: {}]   ;;  %s5858_s4 = inlined_call_operand.vmem [shape: bf16[9,16,16], index: 4, kind: input, shape index: {}]   ;;  %s5859_s5 = inlined_call_operand.vmem [shape: f32[1,16], index: 5, kind: input, shape index: {}]   ;;  %s5860_s6 = inlined_call_operand.vmem [shape: bf16[16,64], index: 6, kind: input, shape index: {}]   ;;  %s5861_s7 = inlined_call_operand.vmem [shape: f32[1,64], index: 7, kind: input, shape index: {}]   ;;  %s5862_s8 = inlined_call_operand.vmem [shape: bf16[2,2,144,64], index: 8, kind: output, shape index: {}]  }
   0x1   :  { %s4542_s29 = smov 0   ;;  %s4544_s30 = smov 0  }
   0x2   :  { %s4546_s9 = smov 0  }
   0x3 LB: > { %s27_s10 = sadd.s32 1, %s4480_s29  ;;  %s30_s11 = sadd.s32 1, %s4484_s30  ;;  %s4488_s9 = sphi %s4546_s9, %s18_s9   ;;  %s4484_s30 = sphi %s4544_s30, %s5942_s30   ;;  %s4480_s29 = sphi %s4542_s29, %s5941_s29   ;;  %s4476_s28 = sphi %s4540_s28, %s5940_s28   ;;  %s4472_s27 = sphi %s4538_s27, %s5939_s27  }
   0x4   : > { %p28_p0 = scmp.ge.s32.totalorder %s27_s10, 2  ;;  %p3525_p1 = scmp.ge.s32.totalorder %s4488_s9, 1 }
   0x5   : > { %p292_p2 = scmp.lt.s32.totalorder %s4488_s9, 5 }
   0x6   : > { %s5944_s10 = smov (%p28_p0, %s27_s10), 0  ;;  %s5946_s11 = smov (!%p28_p0, %s30_s11), %s4484_s30 }
   0x7   : > { %p293_p3 = pnand %p3525_p1, %p292_p2  ;;  %p32_p4 = scmp.ge.s32.totalorder %s5946_s11, 2 }
   0x9   : > { %s5948_s11 = smov (%p32_p4, %s5946_s11), 0  ;;  %296 = sbr.rel (%p293_p3) target bundleno = 1013 (0x3f5), region = 52 }
   0xe   : > { %v4388_v0 = vld [vmem:[%s5856_s2 + $0x8] sm:$0xff]   ;;  %p339_p5 = scmp.lt.s32.totalorder %s4476_s28, 1  ;;  %v4389_v1 = vld [vmem:[%s5856_s2] sm:$0xff]   ;;  %p341_p6 = scmp.lt.s32.totalorder %s4472_s27, 1  ;;  %v4490_v2 = vmov 0   ;;  %vm481_vm0 = vcmask 261120  }
   0xf   : > { %3922 = vmatprep.subr.bf16.mxu0 %v4388_v0  ;;  %4334 = vmatprep.subr.bf16.mxu1 %v4388_v0  ;;  %v5878_v44 = vmov 0.0   ;;  %v4404_v45 = vld [vmem:[%s5858_s4 + $0x8] sm:$0xff]   ;;  %v4405_v46 = vld [vmem:[%s5858_s4] sm:$0xff]   ;;  %vm4492_vm1 = vmmov 0   ;;  %vm993_vm2 = vcmask 125952   ;;  %vm1094_vm3 = vcmask 1046528  }
  0x10   : > { %s5950_s28 = smov (!%p339_p5, %s4476_s28), 1  ;;  %3923 = vmatpush3.bf16.msra.mxu0 %v4388_v0  ;;  %4336 = vmatpush3.bf16.msra.mxu1 %v4388_v0  ;;  %s5952_s27 = smov (!%p341_p6, %s4472_s27), 1  ;;  %vm1120_vm4 = vcmask 130048   ;;  %vm1256_vm5 = vsmask.f32 7424  ;;  %vm2006_vm7 = vcmask 1045504  }
  0x11   : > { %3924 = vmatprep.subr.bf16.mxu0 %v4389_v1  ;;  %4335 = vmatprep.subr.bf16.mxu1 %v4389_v1  ;;  %s4339_s16 = smul.u32 54, %s5950_s28  ;;  %vm1478_vm6 = vsmask.f32 6400  ;;  %vm2189_vm8 = vsmask.f32 5376  ;;  %vm2717_vm10 = vcmask 1044480  }
  0x12   : > { %s4338_s17 = smul.u32 27, %s5952_s27  ;;  %4387 = vset.pattern.permute.xlu1 %v4490_v2  ;;  %4386 = vset.pattern.permute.xlu0 %v4490_v2  ;;  %vm2900_vm9 = vsmask.f32 4352  ;;  %vm3395_vm11 = vcmask 519168  }
  0x13   : > { %s4340_s18 = smul.u32 216, %s5952_s27 }
  0x14   : > { %3925 = vmatpush3.bf16.msra.mxu0 %v4389_v1  ;;  %4337 = vmatpush3.bf16.msra.mxu1 %v4389_v1  ;;  %s345_s19 = sadd.s32 %s4339_s16, %s4338_s17  ;;  %s4341_s21 = smul.u32 18, %s5952_s27 }
  0x15   : > { %s3526_s20 = sshll.u32 %s345_s19, 2  ;;  %s4584_s23 = scalar_lea.vmem %s5855_s1, %s4340_s18  ;;  %3954 = vmatprep.subr.bf16.mxu1 %v5878_v44  ;;  %3992 = vmatprep.subr.bf16.mxu0 %v5878_v44 }
  0x16   : > { %s4589_s26 = scalar_lea.vmem %s5854_s0, %s3526_s20  ;;  %v699_v3 = vld [vmem:[%s4584_s23 + $0x20] sm:$0xff]  ;;  %v697_v4 = vld [vmem:[%s4584_s23 + $0x10] sm:$0xff]  ;;  %v700_v5 = vld [vmem:[%s4584_s23 + $0x28] sm:$0xff]  ;;  %s4342_s22 = smul.u32 36, %s5950_s28 }
  0x17   : > { %v4390_v6 = vld [vmem:[%s4589_s26] sm:$0xff]   ;;  %744 = vperm.xlu1 %4387, %v699_v3   ;;  %734 = vperm.xlu0 %4386, %v697_v4   ;;  %v4392_v8 = vld [vmem:[%s4589_s26 + $0x8] sm:$0xff]   ;;  %v4394_v10 = vld [vmem:[%s4589_s26 + $0x10] sm:$0xff]  }
  0x18   : > { %v4391_v7 = vld [vmem:[%s4589_s26 + $0x40] sm:$0xff]   ;;  %3926 = vmatprep.mubr.msk.bf16.mxu0 %vm481_vm0, %v4390_v6  ;;  %v4393_v9 = vld [vmem:[%s4589_s26 + $0x48] sm:$0xff]   ;;  %v4395_v11 = vld [vmem:[%s4589_s26 + $0x50] sm:$0xff]  }
  0x19   : > { %3942 = vmatprep.mubr.msk.bf16.mxu1 %vm481_vm0, %v4391_v7  ;;  %3927 = vmatmul.mubr.msk.bf16.vlgmr.msra.gmra.mxu0 %vm481_vm0, %v4392_v8  ;;  %v4396_v12 = vld [vmem:[%s4589_s26 + $0x18] sm:$0xff]   ;;  %v4398_v14 = vld [vmem:[%s4589_s26 + $0x20] sm:$0xff]   ;;  %v701_v18 = vld [vmem:[%s4584_s23 + $0x30] sm:$0xff] }
  0x1a   : > { %3943 = vmatmul.mubr.msk.bf16.vlgmr.msra.gmra.mxu1 %vm481_vm0, %v4393_v9  ;;  %3930 = vmatprep.mubr.msk.bf16.mxu0 %vm481_vm0, %v4394_v10  ;;  %v4397_v13 = vld [vmem:[%s4589_s26 + $0x58] sm:$0xff]   ;;  %v4399_v15 = vld [vmem:[%s4589_s26 + $0x60] sm:$0xff]   ;;  %v4400_v19 = vld [vmem:[%s4589_s26 + $0x28] sm:$0xff]  }
  0x1b   : > { %749 = vperm.xlu1 %4387, %v700_v5   ;;  %3946 = vmatprep.mubr.msk.bf16.mxu1 %vm481_vm0, %v4395_v11  ;;  %v698_v16 = vld [vmem:[%s4584_s23 + $0x18] sm:$0xff]  ;;  %v704_v20 = vld [vmem:[%s4584_s23 + $0x48] sm:$0xff]  ;;  %v4402_v22 = vld [vmem:[%s4589_s26 + $0x30] sm:$0xff]  }
  0x1c   : > { %739 = vperm.xlu0 %4386, %v698_v16   ;;  %v702_v17 = vld [vmem:[%s4584_s23 + $0x38] sm:$0xff]  ;;  %v4401_v21 = vld [vmem:[%s4589_s26 + $0x68] ss:$0 sps:$4 sm:$0xff]   ;;  %v703_v23 = vld [vmem:[%s4584_s23 + $0x40] sm:$0xff]  ;;  %3955 = vmatpush3.bf16.msra.mxu1 %v4404_v45 }
  0x1d   : > { %v706_v24 = vld [vmem:[%s4584_s23 + $0x58] sm:$0xff]  ;;  %v705_v25 = vld [vmem:[%s4584_s23 + $0x50] sm:$0xff]  ;;  %v708_v27 = vld [vmem:[%s4584_s23 + $0x68] sm:$0xff]  ;;  %4030 = vmatprep.subr.bf16.mxu1 %v5878_v44  ;;  %3993 = vmatpush3.bf16.msra.mxu0 %v4405_v46 }
  0x1e   : > { %v4403_v26 = vld [vmem:[%s4589_s26 + $0x38] sm:$0xff]   ;;  %v707_v28 = vld [vmem:[%s4584_s23 + $0x60] sm:$0xff]  ;;  %v709_v30 = vld [vmem:[%s4584_s23 + $0x70] sm:$0xff]  ;;  %4068 = vmatprep.subr.bf16.mxu0 %v5878_v44 }
  0x1f   : > { %759 = vperm.xlu1 %4387, %v702_v17   ;;  %v710_v29 = vld [vmem:[%s4584_s23 + $0x78] sm:$0xff]  ;;  %v712_v31 = vld [vmem:[%s4584_s23 + $0x88] sm:$0xff]  ;;  %v711_v32 = vld [vmem:[%s4584_s23 + $0x80] sm:$0xff] }
  0x20   : > { %754 = vperm.xlu0 %4386, %v701_v18   ;;  %v714_v33 = vld [vmem:[%s4584_s23 + $0x98] sm:$0xff]  ;;  %v713_v34 = vld [vmem:[%s4584_s23 + $0x90] sm:$0xff]  ;;  %v716_v35 = vld [vmem:[%s4584_s23 + $0xa8] sm:$0xff] }
  0x21   : > { %3931 = vmatmul.mubr.msk.bf16.gmra.mxu0 %vm481_vm0, %v4396_v12  ;;  %v715_v36 = vld [vmem:[%s4584_s23 + $0xa0] sm:$0xff]  ;;  %v718_v37 = vld [vmem:[%s4584_s23 + $0xb8] sm:$0xff]  ;;  %v717_v38 = vld [vmem:[%s4584_s23 + $0xb0] sm:$0xff] }
  0x22   : > { %3947 = vmatmul.mubr.msk.bf16.gmra.mxu1 %vm481_vm0, %v4397_v13  ;;  %3934 = vmatprep.mubr.msk.bf16.mxu0 %vm481_vm0, %v4398_v14  ;;  %v695_v39 = vld [vmem:[%s4584_s23] sm:$0xff]  ;;  %v720_v41 = vld [vmem:[%s4584_s23 + $0xc8] sm:$0xff]  ;;  %v721_v43 = vld [vmem:[%s4584_s23 + $0xd0] sm:$0xff] }
  0x23   : > { %3950 = vmatprep.mubr.msk.bf16.mxu1 %vm481_vm0, %v4399_v15  ;;  %769 = vperm.xlu1 %4387, %v704_v20   ;;  %v719_v40 = vld [vmem:[%s4584_s23 + $0xc0] sm:$0xff]  ;;  %v696_v42 = vld [vmem:[%s4584_s23 + $0x8] sm:$0xff]  ;;  %s359_s23 = sadd.s32 %s4342_s22, %s4341_s21 }
  0x24   : > { %764 = vperm.xlu0 %4386, %v703_v23   ;;  %v4691_v4 = vld [vmem:[%s5857_s3] ss:$0 sm:$0xff]  ;;  %s3528_s26 = sshll.u32 %s359_s23, 2 }
  0x25   : > { %s5784_s14 = scalar_lea.vmem %s5862_s8, %s3528_s26 }
  0x27   : > { %779 = vperm.xlu1 %4387, %v706_v24  }
  0x28   : > { %774 = vperm.xlu0 %4386, %v705_v25  }
  0x29   : > { %3935 = vmatmul.mubr.msk.bf16.gmra.mxu0 %vm481_vm0, %v4400_v19 }
  0x2a   : > { %3951 = vmatmul.mubr.msk.bf16.gmra.mxu1 %vm481_vm0, %v4401_v21  ;;  %3938 = vmatprep.mubr.msk.bf16.mxu0 %vm481_vm0, %v4402_v22 }
  0x2b   : > { %789 = vperm.xlu1 %4387, %v708_v27   ;;  %3956 = vmatprep.mubr.msk.bf16.mxu1 %vm4492_vm1, %v5878_v44 }
  0x2c   : > { %784 = vperm.xlu0 %4386, %v707_v28  }
  0x2f   : > { %799 = vperm.xlu1 %4387, %v710_v29  }
  0x30   : > { %794 = vperm.xlu0 %4386, %v709_v30  }
  0x31   : > { %3939 = vmatmul.mubr.msk.bf16.gmra.mxu0 %vm481_vm0, %v4403_v26 }
  0x32   : > { %3994 = vmatprep.mubr.msk.bf16.mxu0 %vm4492_vm1, %v5878_v44 }
  0x33   : > { %809 = vperm.xlu1 %4387, %v712_v31  }
  0x34   : > { %804 = vperm.xlu0 %4386, %v711_v32  }
  0x37   : > { %819 = vperm.xlu1 %4387, %v714_v33  }
  0x38   : > { %814 = vperm.xlu0 %4386, %v713_v34  }
  0x3b   : > { %829 = vperm.xlu1 %4387, %v716_v35  }
  0x3c   : > { %824 = vperm.xlu0 %4386, %v715_v36  }
  0x3f   : > { %839 = vperm.xlu1 %4387, %v718_v37  }
  0x40   : > { %834 = vperm.xlu0 %4386, %v717_v38  }
  0x43   : > { %724 = vperm.xlu1 %4387, %v695_v39  }
  0x44   : > { %844 = vperm.xlu0 %4386, %v719_v40  }
  0x47   : > { %849 = vperm.xlu1 %4387, %v720_v41  }
  0x48   : > { %729 = vperm.xlu0 %4386, %v696_v42  }
  0x4c   : > { %854 = vperm.xlu0 %4386, %v721_v43  }
  0x92   : > { %v735_v47 = vpop.permute.xlu0 %734  ;;  %v4660_v48 = vpop.permute.xlu1 %744 }
  0x96   : > { %v4662_v50 = vpop.permute.xlu1 %749 }
  0x97   : > { %v740_v49 = vpop.permute.xlu0 %739 }
  0x9a   : > { %v4666_v52 = vpop.permute.xlu1 %759 }
  0x9b   : > { %v4664_v51 = vpop.permute.xlu0 %754 }
  0x9e   : > { %v4670_v54 = vpop.permute.xlu1 %769 }
  0x9f   : > { %v4668_v53 = vpop.permute.xlu0 %764 }
  0xa2   : > { %v4674_v56 = vpop.permute.xlu1 %779 }
  0xa3   : > { %v4672_v55 = vpop.permute.xlu0 %774 }
  0xa6   : > { %v4678_v58 = vpop.permute.xlu1 %789 }
  0xa7   : > { %v4676_v57 = vpop.permute.xlu0 %784 }
  0xaa   : > { %v4682_v60 = vpop.permute.xlu1 %799 }
  0xab   : > { %v4680_v59 = vpop.permute.xlu0 %794 }
  0xae   : > { %v810_v62 = vpop.permute.xlu1 %809 }
  0xaf   : > { %v805_v61 = vpop.permute.xlu0 %804 }
  0xb2   : > { %v820_v0 = vpop.permute.xlu1 %819 }
  0xb3   : > { %v815_v63 = vpop.permute.xlu0 %814 }
  0xb6   : > { %v4686_v2 = vpop.permute.xlu1 %829 }
  0xb7   : > { %v4684_v1 = vpop.permute.xlu0 %824 }
  0xba   : > { %v4693_v5 = vpop.permute.xlu1 %839 }
  0xbb   : > { %v835_v3 = vpop.permute.xlu0 %834 }
  0xbe   : > { %v725_v17 = vpop.permute.xlu1 %724 }
  0xbf   : > { %v4697_v11 = vpop.permute.xlu0 %844 }
  0xc3   : > { %v730_v33 = vpop.permute.xlu0 %729 }
  0xd9   : > { %v3928_v6 = vpop.f32.mrf.mxu0 }
  0xda   : > { %v567_v7 = vadd.f32 %v3928_v6, %v4691_v4  ;;  %v3944_v8 = vpop.f32.mrf.mxu1 }
  0xdb   : > { %v631_v9 = vadd.f32 %v3944_v8, %v4691_v4  ;;  %v558_v10 = vpop.f32.mrf.mxu0 }
  0xdc   : > { %v670_v12 = vmax.f32 %v567_v7, 0.0  ;;  %v622_v13 = vpop.f32.mrf.mxu1 }
  0xdd   : > { %v686_v14 = vmax.f32 %v631_v9, 0.0  ;;  %v623_v15 = vadd.f32 %v4691_v4, %v622_v13  ;;  %v3929_v16 = vpop.f32.mrf.mxu0 }
  0xde   : > { %v859_v18 = vmul.f32 %v735_v47, %v670_v12  ;;  %v570_v19 = vadd.f32 %v3929_v16, %v4691_v4  ;;  %v3945_v20 = vpop.f32.mrf.mxu1 }
  0xdf   : > { %v875_v21 = vmul.f32 %v815_v63, %v686_v14  ;;  %v684_v22 = vmax.f32 %v623_v15, 0.0  ;;  %v634_v23 = vadd.f32 %v3945_v20, %v4691_v4  ;;  %v561_v24 = vpop.f32.mrf.mxu0 }
  0xe0   : > { %v3763_v25 = vpack.c.bf16 %v859_v18, %v859_v18  ;;  %v671_v26 = vmax.f32 %v570_v19, 0.0  ;;  %v625_v27 = vpop.f32.mrf.mxu1 }
  0xe1   : > { %v3779_v28 = vpack.c.bf16 %v875_v21, %v875_v21  ;;  %v873_v29 = vmul.f32 %v805_v61, %v684_v22  ;;  %v687_v30 = vmax.f32 %v634_v23, 0.0  ;;  %v626_v31 = vadd.f32 %v4691_v4, %v625_v27  ;;  %v3932_v32 = vpop.f32.mrf.mxu0 }
  0xe2   : > { %996 = vst.msk [vmem:[#allocation2 + $0x8] sm:$0xf] %vm993_vm2, %v3763_v25  ;;  %v860_v34 = vmul.f32 %v740_v49, %v671_v26  ;;  %v583_v35 = vadd.f32 %v3932_v32, %v4691_v4  ;;  %v3948_v36 = vpop.f32.mrf.mxu1 }
  0xe3   : > { %1012 = vst.msk [vmem:[#allocation2 + $0x48] sm:$0xf] %vm993_vm2, %v3779_v28  ;;  %v3777_v37 = vpack.c.bf16 %v873_v29, %v873_v29  ;;  %v876_v38 = vmul.f32 %v820_v0, %v687_v30  ;;  %v685_v39 = vmax.f32 %v626_v31, 0.0  ;;  %v647_v40 = vadd.f32 %v3948_v36, %v4691_v4  ;;  %v574_v41 = vpop.f32.mrf.mxu0 }
  0xe4   : > { %v3764_v42 = vpack.c.bf16 %v860_v34, %v860_v34  ;;  %v674_v43 = vmax.f32 %v583_v35, 0.0  ;;  %v575_v45 = vadd.f32 %v4691_v4, %v574_v41  ;;  %v638_v46 = vpop.f32.mrf.mxu1 }
  0xe5   : > { %1010 = vst.msk [vmem:[#allocation2 + $0x40] sm:$0xf] %vm993_vm2, %v3777_v37  ;;  %v3780_v47 = vpack.c.bf16 %v876_v38, %v876_v38  ;;  %v874_v49 = vmul.f32 %v810_v62, %v685_v39  ;;  %v690_v61 = vmax.f32 %v647_v40, 0.0  ;;  %v639_v63 = vadd.f32 %v4691_v4, %v638_v46  ;;  %v3933_v6 = vpop.f32.mrf.mxu0 }
  0xe6   : > { %997 = vst.msk [vmem:[#allocation2 + $0xc] sm:$0xf] %vm993_vm2, %v3764_v42  ;;  %v863_v0 = vmul.f32 %v4664_v51, %v674_v43  ;;  %v672_v7 = vmax.f32 %v575_v45, 0.0  ;;  %v586_v8 = vadd.f32 %v3933_v6, %v4691_v4  ;;  %v3949_v9 = vpop.f32.mrf.mxu1 }
  0xe7   : > { %1013 = vst.msk [vmem:[#allocation2 + $0x4c] sm:$0xf] %vm993_vm2, %v3780_v47  ;;  %v3778_v10 = vpack.c.bf16 %v874_v49, %v874_v49  ;;  %v879_v12 = vmul.f32 %v835_v3, %v690_v61  ;;  %v688_v13 = vmax.f32 %v639_v63, 0.0  ;;  %v650_v14 = vadd.f32 %v3949_v9, %v4691_v4  ;;  %v577_v62 = vpop.f32.mrf.mxu0 }
  0xe8   : > { %v3767_v15 = vpack.c.bf16 %v863_v0, %v863_v0  ;;  %v861_v16 = vmul.f32 %v4660_v48, %v672_v7  ;;  %v675_v17 = vmax.f32 %v586_v8, 0.0  ;;  %v578_v18 = vadd.f32 %v4691_v4, %v577_v62  ;;  %v641_v19 = vpop.f32.mrf.mxu1 }
  0xe9   : > { %1011 = vst.msk [vmem:[#allocation2 + $0x44] sm:$0xf] %vm993_vm2, %v3778_v10  ;;  %v3783_v51 = vpack.c.bf16 %v879_v12, %v879_v12  ;;  %v877_v20 = vmul.f32 %v4684_v1, %v688_v13  ;;  %v691_v21 = vmax.f32 %v650_v14, 0.0  ;;  %v642_v22 = vadd.f32 %v4691_v4, %v641_v19  ;;  %v3936_v3 = vpop.f32.mrf.mxu0  ;;  %v1021_v10 = vld [vmem:[#allocation2 + $0x8] sm:$0xf]  ;;  %v850_v14 = vpop.permute.xlu1 %849 }
  0xea   : > { %1000 = vst.msk [vmem:[#allocation2 + $0x18] sm:$0xf] %vm993_vm2, %v3767_v15  ;;  %v3765_v23 = vpack.c.bf16 %v861_v16, %v861_v16  ;;  %v864_v24 = vmul.f32 %v4666_v52, %v675_v17  ;;  %v673_v25 = vmax.f32 %v578_v18, 0.0  ;;  %v599_v48 = vadd.f32 %v3936_v3, %v4691_v4  ;;  %v3952_v26 = vpop.f32.mrf.mxu1  ;;  %v1042_v17 = vld [vmem:[#allocation2 + $0x8] sm:$0xe] }
  0xeb   : > { %1016 = vst.msk [vmem:[#allocation2 + $0x58] sm:$0xf] %vm993_vm2, %v3783_v51  ;;  %v3781_v27 = vpack.c.bf16 %v877_v20, %v877_v20  ;;  %v880_v28 = vmul.f32 %v4693_v5, %v691_v21  ;;  %v689_v29 = vmax.f32 %v642_v22, 0.0  ;;  %v590_v1 = vpop.f32.mrf.mxu0  ;;  %v855_v5 = vpop.permute.xlu0 %854 }
  0xec   : > { %998 = vst.msk [vmem:[#allocation2 + $0x10] sm:$0xf] %vm993_vm2, %v3765_v23  ;;  %v3768_v30 = vpack.c.bf16 %v864_v24, %v864_v24  ;;  %v862_v31 = vmul.f32 %v4662_v50, %v673_v25  ;;  %v678_v32 = vmax.f32 %v599_v48, 0.0  ;;  %v591_v33 = vadd.f32 %v4691_v4, %v590_v1  ;;  %v654_v52 = vpop.f32.mrf.mxu1 }
  0xed   : > { %1014 = vst.msk [vmem:[#allocation2 + $0x50] sm:$0xf] %vm993_vm2, %v3781_v27  ;;  %v3784_v34 = vpack.c.bf16 %v880_v28, %v880_v28  ;;  %v878_v35 = vmul.f32 %v4686_v2, %v689_v29  ;;  %v655_v36 = vadd.f32 %v4691_v4, %v654_v52  ;;  %v3937_v37 = vpop.f32.mrf.mxu0  ;;  %v1022_v46 = vld [vmem:[#allocation2 + $0xc] sm:$0xf] }
  0xee   : > { %1001 = vst.msk [vmem:[#allocation2 + $0x1c] sm:$0xf] %vm993_vm2, %v3768_v30  ;;  %v3766_v38 = vpack.c.bf16 %v862_v31, %v862_v31  ;;  %v867_v39 = vmul.f32 %v4672_v55, %v678_v32  ;;  %v676_v40 = vmax.f32 %v591_v33, 0.0  ;;  %v602_v50 = vadd.f32 %v3937_v37, %v4691_v4  ;;  %v3953_v41 = vpop.f32.mrf.mxu1 }
  0xef   : > { %1017 = vst.msk [vmem:[#allocation2 + $0x5c] sm:$0xf] %vm993_vm2, %v3784_v34  ;;  %v3782_v42 = vpack.c.bf16 %v878_v35, %v878_v35  ;;  %v692_v43 = vmax.f32 %v655_v36, 0.0  ;;  %v593_v45 = vpop.f32.mrf.mxu0  ;;  %v3609_v13 = vcombine.low %v1021_v10, %v1022_v46  ;;  %v4747_v18 = vcombine.low %v1042_v17, %v1022_v46 }
  0xf0   : > { %999 = vst.msk [vmem:[#allocation2 + $0x14] sm:$0xf] %vm993_vm2, %v3766_v38  ;;  %v3771_v2 = vpack.c.bf16 %v867_v39, %v867_v39  ;;  %v865_v47 = vmul.f32 %v4668_v53, %v676_v40  ;;  %v679_v49 = vmax.f32 %v602_v50, 0.0  ;;  %v594_v61 = vadd.f32 %v4691_v4, %v593_v45  ;;  %v657_v63 = vpop.f32.mrf.mxu1 }
  0xf1   : > { %1015 = vst.msk [vmem:[#allocation2 + $0x54] sm:$0xf] %vm993_vm2, %v3782_v42  ;;  %v881_v55 = vmul.f32 %v4697_v11, %v692_v43  ;;  %v3940_v6 = vpop.f32.mrf.mxu0  ;;  %v1260_v19 = vshll.u32 %v3609_v13, 16  ;;  %v1095_v27 = vrot.slane %v4747_v18, 1  ;;  %v1258_v29 = vshrl.u32 %v3609_v13, 16 }
  0xf2   : > { %1004 = vst.msk [vmem:[#allocation2 + $0x28] sm:$0xf] %vm993_vm2, %v3771_v2  ;;  %v3769_v0 = vpack.c.bf16 %v865_v47, %v865_v47  ;;  %v868_v7 = vmul.f32 %v4674_v56, %v679_v49  ;;  %v677_v8 = vmax.f32 %v594_v61, 0.0  ;;  %v615_v9 = vadd.f32 %v3940_v6, %v4691_v4 }
  0xf3   : > { %v3785_v12 = vpack.c.bf16 %v881_v55, %v881_v55  ;;  %v606_v53 = vpop.f32.mrf.mxu0  ;;  %v1262_v23 = vrot.slane %v1260_v19, 1  ;;  %v1480_v50 = vshrl.u32 %v4747_v18, 16  ;;  %v1483_v46 = vshll.u32 %v4747_v18, 16  ;;  %v4806_v18 = vld [vmem:[#allocation2 + $0x40] sm:$0xff]  }
  0xf4   : > { %1002 = vst.msk [vmem:[#allocation2 + $0x20] sm:$0xf] %vm993_vm2, %v3769_v0  ;;  %v3772_v62 = vpack.c.bf16 %v868_v7, %v868_v7  ;;  %v866_v15 = vmul.f32 %v4670_v54, %v677_v8  ;;  %v682_v11 = vmax.f32 %v615_v9, 0.0  ;;  %v607_v16 = vadd.f32 %v4691_v4, %v606_v53 }
  0xf5   : > { %1018 = vst.msk [vmem:[#allocation2 + $0x60] sm:$0xf] %vm993_vm2, %v3785_v12  ;;  %v3941_v56 = vpop.f32.mrf.mxu0  ;;  %v1263_v33 = vor.u32 %v1262_v23, %v1258_v29  ;;  %v4410_v34 = vld [vmem:[#allocation2 + $0x18] sm:$0xff]   ;;  %v1482_v45 = vrot.slane %v1480_v50, 1  ;;  %v1485_v61 = vrot.slane %v1483_v46, 2 }
  0xf6   : > { %1005 = vst.msk [vmem:[#allocation2 + $0x2c] sm:$0xf] %vm993_vm2, %v3772_v62  ;;  %v3770_v51 = vpack.c.bf16 %v866_v15, %v866_v15  ;;  %v871_v20 = vmul.f32 %v4680_v59, %v682_v11  ;;  %v680_v21 = vmax.f32 %v607_v16, 0.0  ;;  %v618_v22 = vadd.f32 %v3941_v56, %v4691_v4  ;;  %v4408_v59 = vld [vmem:[%s5858_s4 + $0x10] sm:$0xff]  }
  0xf7   : > { %v609_v3 = vpop.f32.mrf.mxu0  ;;  %v4407_v54 = vld [vmem:[#allocation2 + $0x10] sm:$0xff]   ;;  %v1273_v5 = vshll.u32 %v4410_v34, 16  ;;  %v1098_v38 = vrot.slane %v4410_v34, 1  ;;  %v1277_v55 = vshrl.u32 %v4410_v34, 16  ;;  %v1486_v6 = vor.u32 %v1485_v61, %v1482_v45  ;;  %v4829_v34 = vld [vmem:[#allocation2 + $0x48] sm:$0xff]  }
  0xf8   : > { %1003 = vst.msk [vmem:[#allocation2 + $0x24] sm:$0xf] %vm993_vm2, %v3770_v51  ;;  %v3775_v24 = vpack.c.bf16 %v871_v20, %v871_v20  ;;  %v869_v25 = vmul.f32 %v4676_v57, %v680_v21  ;;  %v683_v48 = vmax.f32 %v618_v22, 0.0  ;;  %v610_v26 = vadd.f32 %v4691_v4, %v609_v3  ;;  %v4418_v57 = vld [vmem:[%s5858_s4 + $0x18] sm:$0xff]  }
  0xf9   : > { %v1096_v28 = vrot.slane %v4407_v54, 1  ;;  %v1265_v1 = vshll.u32 %v4407_v54, 16  ;;  %v1275_v42 = vrot.slane %v1273_v5, 1  ;;  %v1491_v62 = vrot.slane %v1277_v55, 1 }
  0xfa   : > { %1008 = vst.msk [vmem:[#allocation2 + $0x38] sm:$0xf] %vm993_vm2, %v3775_v24  ;;  %v3773_v30 = vpack.c.bf16 %v869_v25, %v869_v25  ;;  %v872_v31 = vmul.f32 %v4682_v60, %v683_v48  ;;  %v681_v32 = vmax.f32 %v610_v26, 0.0  ;;  %v1492_v16 = vrot.slane %v1273_v5, 2 }
  0xfb   : > { %v1097_v4 = vsel %vm1094_vm3, %v1095_v27, %v1096_v28  ;;  %v1267_v52 = vrot.slane %v1265_v1, 1  ;;  %v1099_v41 = vsel %vm1094_vm3, %v1096_v28, %v1098_v38  ;;  %v1488_v49 = vrot.slane %v1265_v1, 2 }
  0xfc   : > { %1006 = vst.msk [vmem:[#allocation2 + $0x30] sm:$0xf] %vm993_vm2, %v3773_v30  ;;  %v3776_v35 = vpack.c.bf16 %v872_v31, %v872_v31  ;;  %v870_v36 = vmul.f32 %v4678_v58, %v681_v32  ;;  %3957 = vmatmul.mubr.msk.bf16.vlgmr.msra.gmra.mxu1 %vm1120_vm4, %v1097_v4  ;;  %v1269_v58 = vshrl.u32 %v4407_v54, 16  ;;  %v1279_v13 = vor.u32 %v1277_v55, %v1275_v42 }
  0xfd   : > { %4031 = vmatpush3.bf16.msra.mxu1 %v4408_v59  ;;  %v1268_v60 = vsel %vm1256_vm5, %v1263_v33, %v1267_v52  ;;  %3960 = vmatprep.mubr.msk.bf16.mxu1 %vm4492_vm1, %v5878_v44  ;;  %v4788_v8 = vld [vmem:[#allocation2 + $0x28] sm:$0xff]   ;;  %v1493_v20 = vor.u32 %v1492_v16, %v1491_v62  ;;  %v1313_v59 = vshll.u32 %v4806_v18, 16  ;;  %v1317_v32 = vshrl.u32 %v4806_v18, 16 }
  0xfe   : > { %1009 = vst.msk [vmem:[#allocation2 + $0x3c] sm:$0xf] %vm993_vm2, %v3776_v35  ;;  %v3774_v37 = vpack.c.bf16 %v870_v36, %v870_v36  ;;  %3995 = vmatmul.mubr.msk.bf16.vlgmr.msra.gmra.mxu0 %vm1120_vm4, %v1268_v60  ;;  %4106 = vmatprep.subr.bf16.mxu1 %v5878_v44  ;;  %v1271_v39 = vor.u32 %v1269_v58, %v1267_v52  ;;  %v1487_v43 = vrot.slane %v1269_v58, 1  ;;  %v1293_v11 = vshrl.u32 %v4788_v8, 16  ;;  %v4831_v35 = vld [vmem:[#allocation2 + $0x18] sm:$0xff]  }
  0xff   : > { %3998 = vmatprep.mubr.msk.bf16.mxu0 %vm4492_vm1, %v5878_v44  ;;  %4069 = vmatpush3.bf16.msra.mxu0 %v4418_v57  ;;  %v4411_v40 = vld [vmem:[#allocation2 + $0x20] sm:$0xff]   ;;  %v1289_v17 = vshll.u32 %v4788_v8, 16  ;;  %v1102_v22 = vrot.slane %v4788_v8, 1  ;;  %v1108_v52 = vrot.slane %v4806_v18, 1  ;;  %v1511_v46 = vrot.slane %v1317_v32, 1 }
 0x100   : > { %1007 = vst.msk [vmem:[#allocation2 + $0x34] sm:$0xf] %vm993_vm2, %v3774_v37  ;;  %4144 = vmatprep.subr.bf16.mxu0 %v5878_v44  ;;  %v1276_v2 = vsel %vm1256_vm5, %v1271_v39, %v1275_v42  ;;  %v1281_v47 = vshll.u32 %v4411_v40, 16  ;;  %v1100_v63 = vrot.slane %v4411_v40, 1  ;;  %v1489_v0 = vor.u32 %v1488_v49, %v1487_v43  ;;  %v4847_v43 = vld [vmem:[#allocation2 + $0x20] sm:$0xff]  }
 0x101   : > { %v1285_v9 = vshrl.u32 %v4411_v40, 16  ;;  %v1499_v25 = vrot.slane %v1293_v11, 1  ;;  %v1291_v48 = vrot.slane %v1289_v17, 1  ;;  %v1500_v27 = vrot.slane %v1289_v17, 2  ;;  %v4879_v17 = vld [vmem:[#allocation2 + $0x48] sm:$0xff]  }
 0x102   : > { %v1283_v7 = vrot.slane %v1281_v47, 1  ;;  %v4793_v12 = vsel %vm1478_vm6, %v1486_v6, %v1489_v0  ;;  %v1101_v53 = vsel %vm1094_vm3, %v1098_v38, %v1100_v63  ;;  %v1496_v21 = vrot.slane %v1281_v47, 2 }
 0x103   : > { %v1495_v19 = vrot.slane %v1285_v9, 1  ;;  %v4814_v23 = vsel %vm1478_vm6, %v1489_v0, %v1493_v20  ;;  %v1103_v28 = vsel %vm1094_vm3, %v1100_v63, %v1102_v22  ;;  %v1501_v57 = vor.u32 %v1500_v27, %v1499_v25  ;;  %v4429_v63 = vld [vmem:[#allocation2 + $0x50] ss:$0 sps:$4 sm:$0x33]  }
 0x104   : > { %3961 = vmatmul.mubr.msk.bf16.gmra.mxu1 %vm1120_vm4, %v1099_v41  ;;  %v1284_v15 = vsel %vm1256_vm5, %v1279_v13, %v1283_v7  ;;  %v1287_v54 = vor.u32 %v1285_v9, %v1283_v7  ;;  %v4840_v39 = vrot.slane %v1313_v59, 1  ;;  %v1325_v40 = vshrl.u32 %v4829_v34, 16  ;;  %v4859_v7 = vld [vmem:[#allocation2 + $0x28] sm:$0xff]  }
 0x105   : > { %3964 = vmatprep.mubr.msk.bf16.mxu1 %vm4492_vm1, %v5878_v44  ;;  %v4797_v14 = vld [vmem:[#allocation2 + $0x38] sm:$0xff]   ;;  %v1497_v24 = vor.u32 %v1496_v21, %v1495_v19  ;;  %v1110_v42 = vrot.slane %v4829_v34, 1  ;;  %v1321_v47 = vshll.u32 %v4829_v34, 16  ;;  %v1763_v49 = vshrl.u32 %v4831_v35, 16  ;;  %v4885_v19 = vld [vmem:[#allocation2 + $0x14] sm:$0xf] }
 0x106   : > { %3999 = vmatmul.mubr.msk.bf16.gmra.mxu0 %vm1120_vm4, %v1276_v2  ;;  %v1305_v3 = vshll.u32 %v4797_v14, 16  ;;  %v1309_v26 = vshrl.u32 %v4797_v14, 16  ;;  %v1292_v4 = vsel %vm1256_vm5, %v1287_v54, %v1291_v48  ;;  %v1106_v33 = vrot.slane %v4797_v14, 1  ;;  %v4877_v16 = vld [vmem:[#allocation2 + $0x38] sm:$0xff]  }
 0x107   : > { %4002 = vmatprep.mubr.msk.bf16.mxu0 %vm4492_vm1, %v5878_v44  ;;  %v4790_v10 = vld [vmem:[#allocation2 + $0x30] sm:$0xff]   ;;  %v4820_v29 = vsel %vm1478_vm6, %v1493_v20, %v1497_v24  ;;  %v4835_v37 = vsel %vm1478_vm6, %v1497_v24, %v1501_v57  ;;  %v1295_v2 = vor.u32 %v1293_v11, %v1291_v48  ;;  %v1512_v61 = vrot.slane %v1313_v59, 2  ;;  %v4888_v20 = vld [vmem:[#allocation2 + $0x40] sm:$0xff]  }
 0x108   : > { %v1297_v56 = vshll.u32 %v4790_v10, 16  ;;  %v1301_v51 = vshrl.u32 %v4790_v10, 16  ;;  %v1307_v31 = vrot.slane %v1305_v3, 1  ;;  %v1507_v58 = vrot.slane %v1309_v26, 1 }
 0x109   : > { %v1508_v5 = vrot.slane %v1305_v3, 2  ;;  %v1104_v38 = vrot.slane %v4790_v10, 1  ;;  %v4856_v6 = vsel %vm1094_vm3, %v1106_v33, %v1108_v52  ;;  %v1766_v0 = vshll.u32 %v4831_v35, 16 }
 0x10a   : > { %v1503_v1 = vrot.slane %v1301_v51, 1  ;;  %v1504_v30 = vrot.slane %v1297_v56, 2  ;;  %v1299_v60 = vrot.slane %v1297_v56, 1  ;;  %v1311_v41 = vor.u32 %v1309_v26, %v1307_v31 }
 0x10b   : > { %v1509_v45 = vor.u32 %v1508_v5, %v1507_v58  ;;  %v1105_v9 = vsel %vm1094_vm3, %v1102_v22, %v1104_v38  ;;  %v1107_v10 = vsel %vm1094_vm3, %v1104_v38, %v1106_v33  ;;  %v1513_v13 = vor.u32 %v1512_v61, %v1511_v46 }
 0x10c   : > { %3965 = vmatmul.mubr.msk.bf16.gmra.mxu1 %vm1120_vm4, %v1101_v53  ;;  %v1505_v36 = vor.u32 %v1504_v30, %v1503_v1  ;;  %v1303_v55 = vor.u32 %v1301_v51, %v1299_v60  ;;  %v4866_v53 = vld [vmem:[#allocation2 + $0x30] sm:$0xff]   ;;  %v1515_v14 = vrot.slane %v1325_v40, 1  ;;  %v1300_v62 = vsel %vm1256_vm5, %v1295_v2, %v1299_v60 }
 0x10d   : > { %3968 = vmatprep.mubr.msk.bf16.mxu1 %vm4492_vm1, %v5878_v44  ;;  %v1772_v11 = vshrl.u32 %v4847_v43, 16  ;;  %v1516_v56 = vrot.slane %v1321_v47, 2  ;;  %v1775_v51 = vshll.u32 %v4847_v43, 16  ;;  %v4891_v21 = vsel %vm1478_vm6, %v1509_v45, %v1513_v13  ;;  %v1999_v1 = vld [vmem:[#allocation2 + $0x10] sm:$0xc] }
 0x10e   : > { %4003 = vmatmul.mubr.msk.bf16.gmra.mxu0 %vm1120_vm4, %v1284_v15  ;;  %v4844_v50 = vsel %vm1478_vm6, %v1501_v57, %v1505_v36  ;;  %v4862_v8 = vsel %vm1478_vm6, %v1505_v36, %v1509_v45  ;;  %v4874_v15 = vsel %vm1256_vm5, %v1311_v41, %v4840_v39  ;;  %v1520_v22 = vshrl.u32 %v4429_v63, 16 }
 0x10f   : > { %4006 = vmatprep.mubr.msk.bf16.mxu0 %vm4492_vm1, %v5878_v44  ;;  %v1523_v3 = vshll.u32 %v4429_v63, 16  ;;  %v1308_v54 = vsel %vm1256_vm5, %v1303_v55, %v1307_v31  ;;  %v5874_v24 = vshrl.u32 %v4859_v7, 16  ;;  %v5864_v25 = vshll.u32 %v4859_v7, 16 }
 0x110   : > { %v1517_v48 = vor.u32 %v1516_v56, %v1515_v14  ;;  %v5863_v26 = vshrl.u32 %v4866_v53, 16  ;;  %v5873_v59 = vshll.u32 %v4866_v53, 16  ;;  %v1522_v27 = vrot.slane %v1520_v22, 1 }
 0x111   : > { %v5870_v30 = vshrl.u32 %v4877_v16, 16  ;;  %v5865_v31 = vshll.u32 %v4877_v16, 16  ;;  %v3657_v33 = vcombine.low %v1999_v1, %v4885_v19  ;;  %v5866_v36 = vshrl.u32 %v4888_v20, 16 }
 0x112   : > { %v4904_v57 = vsel %vm1478_vm6, %v1513_v13, %v1517_v48  ;;  %v5867_v60 = vshll.u32 %v4888_v20, 16  ;;  %v5869_v58 = vshrl.u32 %v4879_v17, 16  ;;  %v2008_v41 = vrot.slane %v4831_v35, 2  ;;  %v5073_v35 = vld [vmem:[#allocation2 + $0x28] sm:$0xff]  }
 0x113   : > { %v2007_v38 = vrot.slane %v3657_v33, 2  ;;  %v2191_v45 = vshrl.u32 %v3657_v33, 16  ;;  %v2194_v46 = vshll.u32 %v3657_v33, 16  ;;  %v5868_v2 = vshll.u32 %v4879_v17, 16  ;;  %5889 = vst [vmem:[#allocation3_spill] sm:$0xff] %v5073_v35 }
 0x114   : > { %3969 = vmatmul.mubr.msk.bf16.gmra.mxu1 %vm1120_vm4, %v1103_v28  ;;  %v1525_v28 = vrot.slane %v1523_v3, 2  ;;  %v2198_v63 = vrot.slane %v1763_v49, 2  ;;  %v2199_v55 = vrot.slane %v1766_v0, 3  ;;  %v2010_v22 = vrot.slane %v4847_v43, 2 }
 0x115   : > { %3972 = vmatprep.mubr.msk.bf16.mxu1 %vm4492_vm1, %v5878_v44  ;;  %v4924_v13 = vsel %vm2006_vm7, %v2007_v38, %v2008_v41  ;;  %v2193_v14 = vrot.slane %v2191_v45, 2  ;;  %v2202_v3 = vrot.slane %v1772_v11, 2  ;;  %v2206_v1 = vrot.slane %v5874_v24, 2 }
 0x116   : > { %4007 = vmatmul.mubr.msk.bf16.gmra.mxu0 %vm1120_vm4, %v1292_v4  ;;  %v4906_v4 = vld [vmem:[#allocation2 + $0x50] sm:$0xff]   ;;  %v1526_v5 = vor.u32 %v1525_v28, %v1522_v27  ;;  %v2200_v56 = vor.u32 %v2199_v55, %v2198_v63  ;;  %v2012_v28 = vrot.slane %v4859_v7, 2  ;;  %v4941_v33 = vsel %vm2006_vm7, %v2008_v41, %v2010_v22 }
 0x117   : > { %4010 = vmatprep.mubr.msk.bf16.mxu0 %vm4492_vm1, %v5878_v44  ;;  %v2207_v38 = vrot.slane %v5864_v25, 3  ;;  %v2210_v63 = vrot.slane %v5863_v26, 2  ;;  %v2211_v55 = vrot.slane %v5873_v59, 3  ;;  %v2018_v26 = vrot.slane %v4888_v20, 2  ;;  %v1684_v59 = vld [vmem:[#allocation2 + $0x10] sm:$0xe] }
 0x118   : > { %v4915_v61 = vsel %vm1478_vm6, %v1517_v48, %v1526_v5  ;;  %v2203_v48 = vrot.slane %v1775_v51, 3  ;;  %v4968_v25 = vld [vmem:[#allocation2 + $0x58] ss:$0 sps:$4 sm:$0x33]  }
 0x11a   : > { %v2204_v5 = vor.u32 %v2203_v48, %v2202_v3  ;;  %v2016_v3 = vrot.slane %v4877_v16, 2  ;;  %v2212_v48 = vor.u32 %v2211_v55, %v2210_v63 }
 0x11c   : > { %3973 = vmatmul.mubr.msk.bf16.gmra.mxu1 %vm1120_vm4, %v1105_v9  ;;  %v5871_v9 = vshrl.u32 %v4906_v4, 16  ;;  %v4957_v41 = vsel %vm2189_vm8, %v2200_v56, %v2204_v5 }
 0x11d   : > { %3976 = vmatprep.mubr.msk.bf16.mxu1 %vm4492_vm1, %v5878_v44 }
 0x11e   : > { %4011 = vmatmul.mubr.msk.bf16.gmra.mxu0 %vm1120_vm4, %v1300_v62  ;;  %v2196_v62 = vrot.slane %v2194_v46, 3  ;;  %v4950_v46 = vsel %vm2006_vm7, %v2010_v22, %v2012_v28  ;;  %v2214_v22 = vrot.slane %v5870_v30, 2 }
 0x11f   : > { %4014 = vmatprep.mubr.msk.bf16.mxu0 %vm4492_vm1, %v5878_v44 }
 0x120   : > { %v2197_v27 = vor.u32 %v2196_v62, %v2193_v14  ;;  %v2208_v14 = vor.u32 %v2207_v38, %v2206_v1  ;;  %v2219_v38 = vrot.slane %v5867_v60, 3  ;;  %v2222_v60 = vrot.slane %v5869_v58, 2 }
 0x122   : > { %v4947_v45 = vsel %vm2189_vm8, %v2197_v27, %v2200_v56  ;;  %v2215_v27 = vrot.slane %v5865_v31, 3  ;;  %v4971_v56 = vsel %vm2189_vm8, %v2204_v5, %v2208_v14  ;;  %v4983_v63 = vsel %vm2189_vm8, %v2208_v14, %v2212_v48 }
 0x123   : > { %v4986_v31 = vsel %vm2006_vm7, %v2016_v3, %v2018_v26  ;;  %v2020_v5 = vrot.slane %v4879_v17, 2  ;;  %v2022_v14 = vrot.slane %v4906_v4, 2 }
 0x124   : > { %3977 = vmatmul.mubr.msk.bf16.gmra.mxu1 %vm1120_vm4, %v1107_v10  ;;  %v5872_v10 = vshll.u32 %v4906_v4, 16  ;;  %v2216_v55 = vor.u32 %v2215_v27, %v2214_v22  ;;  %v2226_v27 = vrot.slane %v5871_v9, 2  ;;  %v1319_v9 = vor.u32 %v1317_v32, %v4840_v39 }
 0x125   : > { %3980 = vmatprep.mubr.msk.bf16.mxu1 %vm4492_vm1, %v5878_v44  ;;  %v5002_v22 = vsel %vm2006_vm7, %v2018_v26, %v2020_v5  ;;  %v1111_v32 = vsel %vm1094_vm3, %v1108_v52, %v1110_v42  ;;  %v1323_v39 = vrot.slane %v1321_v47, 1 }
 0x126   : > { %4015 = vmatmul.mubr.msk.bf16.gmra.mxu0 %vm1120_vm4, %v1308_v54  ;;  %v2014_v54 = vrot.slane %v4866_v53, 2 }
 0x127   : > { %4018 = vmatprep.mubr.msk.bf16.mxu0 %vm4492_vm1, %v5878_v44  ;;  %v1327_v47 = vor.u32 %v1325_v40, %v1323_v39  ;;  %v1768_v40 = vrot.slane %v1766_v0, 2  ;;  %v5075_v0 = vld [vmem:[#allocation2 + $0x30] sm:$0xff]  }
 0x128   : > { %v4960_v62 = vsel %vm2006_vm7, %v2012_v28, %v2014_v54  ;;  %v4974_v1 = vsel %vm2006_vm7, %v2014_v54, %v2016_v3  ;;  %v2218_v28 = vrot.slane %v5866_v36, 2  ;;  %v4434_v54 = vld [vmem:[#allocation2 + $0x58] ss:$0 sps:$4 sm:$0x77]   ;;  %v4999_v3 = vsel %vm2189_vm8, %v2212_v48, %v2216_v55 }
 0x129   : > { %v2024_v48 = vrot.slane %v4968_v25, 2  ;;  %v2231_v58 = vshrl.u32 %v4434_v54, 16  ;;  %v2234_v30 = vshll.u32 %v4434_v54, 16  ;;  %v1324_v54 = vsel %vm1256_vm5, %v1319_v9, %v1323_v39  ;;  %v5087_v39 = vld [vmem:[#allocation2 + $0x48] sm:$0xff]  }
 0x12a   : > { %v2220_v36 = vor.u32 %v2219_v38, %v2218_v28  ;;  %v2227_v28 = vrot.slane %v5872_v10, 3  ;;  %v4417_v10 = vld [vmem:[#allocation2 + $0x50] ss:$0 sps:$4 sm:$0x11]  }
 0x12b   : > { %v1112_v52 = vrot.slane %v4417_v10, 1 }
 0x12c   : > { %3981 = vmatmul.mubr.msk.bf16.gmra.mxu1 %vm1120_vm4, %v4856_v6  ;;  %v2223_v6 = vrot.slane %v5868_v2, 3  ;;  %v5011_v38 = vsel %vm2189_vm8, %v2216_v55, %v2220_v36  ;;  %v2228_v26 = vor.u32 %v2227_v28, %v2226_v27  ;;  %v5024_v55 = vsel %vm2006_vm7, %v2022_v14, %v2024_v48 }
 0x12d   : > { %3984 = vmatprep.mubr.msk.bf16.mxu1 %vm4492_vm1, %v5878_v44  ;;  %v2236_v27 = vrot.slane %v2234_v30, 3  ;;  %v1777_v28 = vrot.slane %v1775_v51, 2  ;;  %v1113_v48 = vsel %vm1094_vm3, %v1110_v42, %v1112_v52  ;;  %v5069_v42 = vld [vmem:[#allocation2 + $0x20] sm:$0xff]   ;;  %v4431_v52 = vld [vmem:[%s5858_s4 + $0x28] sm:$0xff]  }
 0x12e   : > { %4019 = vmatmul.mubr.msk.bf16.gmra.mxu0 %vm1120_vm4, %v4874_v15  ;;  %v2224_v2 = vor.u32 %v2223_v6, %v2222_v60  ;;  %v5014_v15 = vsel %vm2006_vm7, %v2020_v5, %v2022_v14  ;;  %v3635_v60 = vcombine.low %v1684_v59, %v4885_v19  ;;  %v2233_v6 = vrot.slane %v2231_v58, 2 }
 0x12f   : > { %4022 = vmatprep.mubr.msk.bf16.mxu0 %vm4492_vm1, %v5878_v44  ;;  %v1329_v19 = vshll.u32 %v4417_v10, 16  ;;  %v1774_v14 = vrot.slane %v1772_v11, 1  ;;  %v1765_v10 = vrot.slane %v1763_v49, 1  ;;  %v5064_v11 = vld [vmem:[#allocation2 + $0x1c] sm:$0xf] }
 0x130   : > { %v5021_v24 = vsel %vm2189_vm8, %v2220_v36, %v2224_v2  ;;  %v5028_v5 = vsel %vm2189_vm8, %v2224_v2, %v2228_v26  ;;  %v2237_v36 = vor.u32 %v2236_v27, %v2233_v6  ;;  %v1755_v59 = vshrl.u32 %v3635_v60, 16  ;;  %v2710_v49 = vld [vmem:[#allocation2 + $0x18] sm:$0x8]  ;;  %v5082_v27 = vld [vmem:[#allocation2 + $0x40] sm:$0xff]  }
 0x131   : > { %v1758_v30 = vshll.u32 %v3635_v60, 16  ;;  %v1331_v58 = vrot.slane %v1329_v19, 1  ;;  %v5067_v43 = vor.u32 %v1777_v28, %v1774_v14  ;;  %v1769_v51 = vor.u32 %v1768_v40, %v1765_v10  ;;  %v5080_v6 = vld [vmem:[#allocation2 + $0x38] sm:$0xff]  }
 0x132   : > { %v5043_v18 = vsel %vm2189_vm8, %v2228_v26, %v2237_v36  ;;  %v1757_v2 = vrot.slane %v1755_v59, 1  ;;  %v5078_v60 = vcombine.low %v2710_v49, %v5064_v11  ;;  %5891 = vst [vmem:[#allocation5_spill] sm:$0xff] %v5080_v6  ;;  %v5875_v19 = vshrl.u32 %v5069_v42, 16  ;;  %v5103_v14 = vld [vmem:[#allocation2 + $0x58] sm:$0xff]  }
 0x133   : > { %v1760_v9 = vrot.slane %v1758_v30, 2  ;;  %v1332_v26 = vsel %vm1256_vm5, %v1327_v47, %v1331_v58  ;;  %v5876_v59 = vshll.u32 %v5069_v42, 16  ;;  %v5094_v30 = vld [vmem:[#allocation2 + $0x50] sm:$0xff]   ;;  %v5877_v47 = vshrl.u32 %v5073_v35, 16 }
 0x134   : > { %3985 = vmatmul.mubr.msk.bf16.gmra.mxu1 %vm1120_vm4, %v1111_v32  ;;  %5890 = vst [vmem:[#allocation4_spill] sm:$0xff] %v5078_v60  ;;  %v4419_v32 = vld [vmem:[%s5858_s4 + $0x20] sm:$0xff]   ;;  %v5880_v58 = vshll.u32 %v5073_v35, 16  ;;  %v5886_v28 = vshrl.u32 %v5080_v6, 16  ;;  %v2902_v40 = vshrl.u32 %v5078_v60, 16  ;;  %v5894_v35 = vshll.u32 %v5082_v27, 16 }
 0x135   : > { %3988 = vmatprep.mubr.msk.bf16.mxu1 %vm4492_vm1, %v5878_v44  ;;  %v1761_v34 = vor.u32 %v1760_v9, %v1757_v2  ;;  %v5883_v2 = vshrl.u32 %v5075_v0, 16  ;;  %v5885_v9 = vshll.u32 %v5075_v0, 16 }
 0x136   : > { %4023 = vmatmul.mubr.msk.bf16.gmra.mxu0 %vm1120_vm4, %v1324_v54  ;;  %v1779_v54 = vsel %vm1478_vm6, %v1769_v51, %v5067_v43  ;;  %v2904_v10 = vrot.slane %v2902_v40, 3 }
 0x137   : > { %4026 = vmatprep.mubr.msk.bf16.mxu0 %vm4492_vm1, %v5878_v44  ;;  %v1770_v36 = vsel %vm1478_vm6, %v1761_v34, %v1769_v51 }
 0x13c   : > { %3989 = vmatmul.mubr.msk.bf16.gmra.mxu1 %vm1120_vm4, %v1113_v48  ;;  %v2910_v48 = vrot.slane %v5876_v59, 4  ;;  %v2917_v59 = vrot.slane %v5883_v2, 3  ;;  %v2926_v2 = vrot.slane %v5894_v35, 4 }
 0x13d   : > { %4032 = vmatprep.mubr.msk.bf16.mxu1 %vm4492_vm1, %v5878_v44 }
 0x13e   : > { %4027 = vmatmul.mubr.msk.bf16.gmra.mxu0 %vm1120_vm4, %v1332_v26  ;;  %v2913_v26 = vrot.slane %v5877_v47, 3  ;;  %v5892_v47 = vshll.u32 %v5080_v6, 16 }
 0x13f   : > { %4070 = vmatprep.mubr.msk.bf16.mxu0 %vm4492_vm1, %v5878_v44 }
 0x140   : > { %v2922_v34 = vrot.slane %v5892_v47, 4  ;;  %v5898_v47 = vshrl.u32 %v5094_v30, 16 }
 0x144   : > { %4033 = vmatmul.mubr.msk.bf16.vlgmr.msra.gmra.mxu1 %vm1120_vm4, %v4793_v12  ;;  %v2905_v12 = vshll.u32 %v5078_v60, 16  ;;  %v4448_v60 = vld [vmem:[#allocation2 + $0x60] ss:$0 sps:$4 sm:$0xff]  }
 0x145   : > { %4107 = vmatpush3.bf16.msra.mxu1 %v4419_v32  ;;  %4036 = vmatprep.mubr.msk.bf16.mxu1 %vm4492_vm1, %v5878_v44  ;;  %v2909_v32 = vrot.slane %v5875_v19, 3  ;;  %v2914_v19 = vrot.slane %v5880_v58, 4 }
 0x146   : > { %4071 = vmatmul.mubr.msk.bf16.vlgmr.msra.gmra.mxu0 %vm1120_vm4, %v1770_v36  ;;  %4182 = vmatprep.subr.bf16.mxu1 %v5878_v44  ;;  %v2907_v36 = vrot.slane %v2905_v12, 4  ;;  %v2921_v12 = vrot.slane %v5886_v28, 3  ;;  %v5896_v28 = vshll.u32 %v5087_v39, 16 }
 0x147   : > { %4074 = vmatprep.mubr.msk.bf16.mxu0 %vm4492_vm1, %v5878_v44  ;;  %4145 = vmatpush3.bf16.msra.mxu0 %v4431_v52  ;;  %v2911_v40 = vor.u32 %v2910_v48, %v2909_v32  ;;  %v2918_v52 = vrot.slane %v5885_v9, 4  ;;  %v5893_v32 = vshrl.u32 %v5082_v27, 16 }
 0x148   : > { %4220 = vmatprep.subr.bf16.mxu0 %v5878_v44  ;;  %v2908_v51 = vor.u32 %v2907_v36, %v2904_v10  ;;  %v2915_v44 = vor.u32 %v2914_v19, %v2913_v26  ;;  %v2923_v49 = vor.u32 %v2922_v34, %v2921_v12  ;;  %v5895_v10 = vshrl.u32 %v5087_v39, 16 }
 0x149   : > { %v2919_v48 = vor.u32 %v2918_v52, %v2917_v59  ;;  %v2925_v58 = vrot.slane %v5893_v32, 3  ;;  %v2930_v6 = vrot.slane %v5896_v28, 4  ;;  %v2933_v26 = vrot.slane %v5898_v47, 3 }
 0x14a   : > { %v5147_v9 = vsel %vm2900_vm9, %v2908_v51, %v2911_v40  ;;  %v2929_v36 = vrot.slane %v5895_v10, 3  ;;  %v5156_v19 = vsel %vm2900_vm9, %v2911_v40, %v2915_v44  ;;  %v5899_v34 = vmov 0.0  }
 0x14b   : > { %v5159_v59 = vsel %vm2900_vm9, %v2915_v44, %v2919_v48  ;;  %v2927_v35 = vor.u32 %v2926_v2, %v2925_v58  ;;  %v5166_v51 = vsel %vm2900_vm9, %v2919_v48, %v2923_v49  ;;  %v5901_v52 = vshll.u32 %v5094_v30, 16 }
 0x14c   : > { %4037 = vmatmul.mubr.msk.bf16.gmra.mxu1 %vm1120_vm4, %v4814_v23  ;;  %5897 = vst [vmem:[#allocation6_spill] sm:$0xff] %v5159_v59  ;;  %5900 = vst [vmem:[#allocation7_spill] sm:$0xff] %v5166_v51  ;;  %v2931_v28 = vor.u32 %v2930_v6, %v2929_v36  ;;  %v5902_v40 = vshrl.u32 %v5103_v14, 16  ;;  %v5904_v58 = vshll.u32 %v5103_v14, 16  ;;  %v2942_v32 = vshrl.u32 %v4448_v60, 16 }
 0x14d   : > { %4040 = vmatprep.mubr.msk.bf16.mxu1 %vm4492_vm1, %v5899_v34  ;;  %v2934_v23 = vrot.slane %v5901_v52, 4  ;;  %v5174_v44 = vsel %vm2900_vm9, %v2923_v49, %v2927_v35  ;;  %v2945_v10 = vshll.u32 %v4448_v60, 16  ;;  %v5905_v6 = vshrl.u32 %v4859_v7, 16 }
 0x14e   : > { %v2937_v12 = vrot.slane %v5902_v40, 3  ;;  %4075 = vmatmul.mubr.msk.bf16.gmra.mxu0 %vm1120_vm4, %v1779_v54  ;;  %5903 = vst [vmem:[#allocation8_spill] sm:$0xff] %v5174_v44  ;;  %v2938_v2 = vrot.slane %v5904_v58, 4  ;;  %v5906_v36 = vshll.u32 %v4859_v7, 16  ;;  %v5185_v52 = vsel %vm2900_vm9, %v2927_v35, %v2931_v28 }
 0x14f   : > { %4078 = vmatprep.mubr.msk.bf16.mxu0 %vm4492_vm1, %v5899_v34  ;;  %v1783_v48 = vrot.slane %v5905_v6, 1  ;;  %v2935_v54 = vor.u32 %v2934_v23, %v2933_v26  ;;  %v2944_v40 = vrot.slane %v2942_v32, 3  ;;  %v2947_v44 = vrot.slane %v2945_v10, 4 }
 0x150   : > { %v1786_v47 = vrot.slane %v5906_v36, 2  ;;  %v2939_v49 = vor.u32 %v2938_v2, %v2937_v12  ;;  %v5907_v26 = vshrl.u32 %v4866_v53, 16  ;;  %v5908_v23 = vshll.u32 %v4866_v53, 16 }
 0x151   : > { %v5188_v58 = vsel %vm2900_vm9, %v2931_v28, %v2935_v54  ;;  %v2948_v51 = vor.u32 %v2947_v44, %v2944_v40  ;;  %v5909_v53 = vshrl.u32 %v4877_v16, 16  ;;  %v5910_v44 = vshll.u32 %v4877_v16, 16 }
 0x152   : > { %v5191_v60 = vsel %vm2900_vm9, %v2935_v54, %v2939_v49  ;;  %v1787_v59 = vor.u32 %v1786_v47, %v1783_v48  ;;  %v1792_v28 = vrot.slane %v5907_v26, 1  ;;  %v1795_v12 = vrot.slane %v5908_v23, 2 }
 0x153   : > { %v5196_v7 = vsel %vm2900_vm9, %v2939_v49, %v2948_v51  ;;  %v1801_v51 = vrot.slane %v5909_v53, 1  ;;  %v1804_v2 = vrot.slane %v5910_v44, 2  ;;  %v5912_v16 = vshll.u32 %v4888_v20, 16  ;;  %v4435_v53 = vld [vmem:[%s5858_s4 + $0x38] sm:$0xff]  }
 0x154   : > { %4041 = vmatmul.mubr.msk.bf16.gmra.mxu1 %vm1120_vm4, %v4820_v29  ;;  %v1788_v35 = vsel %vm1478_vm6, %v5067_v43, %v1787_v59  ;;  %v1796_v29 = vor.u32 %v1795_v12, %v1792_v28  ;;  %v5913_v36 = vshrl.u32 %v4879_v17, 16  ;;  %v5914_v54 = vshll.u32 %v4879_v17, 16 }
 0x155   : > { %4044 = vmatprep.mubr.msk.bf16.mxu1 %vm4492_vm1, %v5899_v34  ;;  %v1805_v32 = vor.u32 %v1804_v2, %v1801_v51  ;;  %v1813_v6 = vrot.slane %v5912_v16, 2  ;;  %v5915_v40 = vshrl.u32 %v4906_v4, 16  ;;  %v5916_v17 = vshll.u32 %v4906_v4, 16 }
 0x156   : > { %4079 = vmatmul.mubr.msk.bf16.gmra.mxu0 %vm1120_vm4, %v1788_v35  ;;  %v1797_v43 = vsel %vm1478_vm6, %v1787_v59, %v1796_v29  ;;  %v5911_v59 = vshrl.u32 %v4888_v20, 16  ;;  %v1819_v47 = vrot.slane %v5913_v36, 1  ;;  %v1822_v49 = vrot.slane %v5914_v54, 2 }
 0x157   : > { %4082 = vmatprep.mubr.msk.bf16.mxu0 %vm4492_vm1, %v5899_v34  ;;  %v1828_v35 = vrot.slane %v5915_v40, 1  ;;  %v1831_v26 = vrot.slane %v5916_v17, 2  ;;  %v1835_v23 = vshrl.u32 %v4968_v25, 16 }
 0x158   : > { %v1810_v10 = vrot.slane %v5911_v59, 1  ;;  %v1823_v20 = vor.u32 %v1822_v49, %v1819_v47 }
 0x159   : > { %v1832_v28 = vor.u32 %v1831_v26, %v1828_v35  ;;  %v1837_v4 = vrot.slane %v1835_v23, 1  ;;  %v2719_v26 = vrot.slane %v5069_v42, 3 }
 0x15a   : > { %v1814_v48 = vor.u32 %v1813_v6, %v1810_v10  ;;  %v5918_v6 = vshll.u32 %v5069_v42, 16 }
 0x15b   : > { %v1833_v12 = vsel %vm1478_vm6, %v1823_v20, %v1832_v28 }
 0x15c   : > { %4045 = vmatmul.mubr.msk.bf16.gmra.mxu1 %vm1120_vm4, %v4835_v37  ;;  %v1806_v37 = vsel %vm1478_vm6, %v1796_v29, %v1805_v32 }
 0x15d   : > { %4048 = vmatprep.mubr.msk.bf16.mxu1 %vm4492_vm1, %v5899_v34 }
 0x15e   : > { %4083 = vmatmul.mubr.msk.bf16.gmra.mxu0 %vm1120_vm4, %v1797_v43 }
 0x15f   : > { %4086 = vmatprep.mubr.msk.bf16.mxu0 %vm4492_vm1, %v5899_v34 }
 0x164   : > { %4049 = vmatmul.mubr.msk.bf16.gmra.mxu1 %vm1120_vm4, %v4844_v50  ;;  %v1815_v50 = vsel %vm1478_vm6, %v1805_v32, %v1814_v48 }
 0x165   : > { %4052 = vmatprep.mubr.msk.bf16.mxu1 %vm4492_vm1, %v5899_v34 }
 0x166   : > { %4087 = vmatmul.mubr.msk.bf16.gmra.mxu0 %vm1120_vm4, %v1806_v37 }
 0x167   : > { %4090 = vmatprep.mubr.msk.bf16.mxu0 %vm4492_vm1, %v5899_v34 }
 0x16c   : > { %4053 = vmatmul.mubr.msk.bf16.gmra.mxu1 %vm1120_vm4, %v4862_v8  ;;  %v1824_v8 = vsel %vm1478_vm6, %v1814_v48, %v1823_v20  ;;  %v2479_v48 = vrot.slane %v5918_v6, 3 }
 0x16d   : > { %4056 = vmatprep.mubr.msk.bf16.mxu1 %vm4492_vm1, %v5899_v34 }
 0x16e   : > { %4091 = vmatmul.mubr.msk.bf16.gmra.mxu0 %vm1120_vm4, %v1815_v50 }
 0x16f   : > { %4094 = vmatprep.mubr.msk.bf16.mxu0 %vm4492_vm1, %v5899_v34 }
 0x174   : > { %4057 = vmatmul.mubr.msk.bf16.gmra.mxu1 %vm1120_vm4, %v4891_v21  ;;  %v1838_v21 = vshll.u32 %v4968_v25, 16 }
 0x175   : > { %4060 = vmatprep.mubr.msk.bf16.mxu1 %vm4492_vm1, %v5899_v34 }
 0x176   : > { %4095 = vmatmul.mubr.msk.bf16.gmra.mxu0 %vm1120_vm4, %v1824_v8  ;;  %v1840_v29 = vrot.slane %v1838_v21, 2 }
 0x177   : > { %4098 = vmatprep.mubr.msk.bf16.mxu0 %vm4492_vm1, %v5899_v34 }
 0x178   : > { %v1841_v43 = vor.u32 %v1840_v29, %v1837_v4 }
 0x17a   : > { %v1842_v25 = vsel %vm1478_vm6, %v1832_v28, %v1841_v43 }
 0x17c   : > { %4061 = vmatmul.mubr.msk.bf16.gmra.mxu1 %vm1120_vm4, %v4904_v57  ;;  %v4433_v57 = vld [vmem:[%s5858_s4 + $0x30] sm:$0xff]  }
 0x17d   : > { %4064 = vmatprep.mubr.msk.bf16.mxu1 %vm4492_vm1, %v5899_v34 }
 0x17e   : > { %4099 = vmatmul.mubr.msk.bf16.gmra.mxu0 %vm1120_vm4, %v1833_v12  ;;  %v5919_v12 = vld [vmem:[#allocation4_spill] sm:$0xff] }
 0x17f   : > { %4102 = vmatprep.mubr.msk.bf16.mxu0 %vm4492_vm1, %v5899_v34  ;;  %v2718_v4 = vrot.slane %v5919_v12, 3 }
 0x184   : > { %4065 = vmatmul.mubr.msk.bf16.gmra.mxu1 %vm1120_vm4, %v4915_v61 }
 0x185   : > { %4108 = vmatprep.mubr.msk.bf16.mxu1 %vm4492_vm1, %v5899_v34 }
 0x186   : > { %4103 = vmatmul.mubr.msk.bf16.gmra.mxu0 %vm1120_vm4, %v1842_v25  ;;  %v2720_v25 = vsel %vm2717_vm10, %v2718_v4, %v2719_v26 }
 0x187   : > { %4146 = vmatprep.mubr.msk.bf16.mxu0 %vm4492_vm1, %v5899_v34 }
 0x18c   : > { %4109 = vmatmul.mubr.msk.bf16.vlgmr.msra.gmra.mxu1 %vm1120_vm4, %v4924_v13 }
 0x18d   : > { %4183 = vmatpush3.bf16.msra.mxu1 %v4433_v57  ;;  %4112 = vmatprep.mubr.msk.bf16.mxu1 %vm4492_vm1, %v5899_v34 }
 0x18e   : > { %4147 = vmatmul.mubr.msk.bf16.vlgmr.msra.gmra.mxu0 %vm1120_vm4, %v4947_v45  ;;  %4258 = vmatprep.subr.bf16.mxu1 %v5899_v34 }
 0x18f   : > { %4150 = vmatprep.mubr.msk.bf16.mxu0 %vm4492_vm1, %v5899_v34  ;;  %4221 = vmatpush3.bf16.msra.mxu0 %v4435_v53 }
 0x190   : > { %4296 = vmatprep.subr.bf16.mxu0 %v5899_v34 }
 0x194   : > { %4113 = vmatmul.mubr.msk.bf16.gmra.mxu1 %vm1120_vm4, %v4941_v33 }
 0x195   : > { %4116 = vmatprep.mubr.msk.bf16.mxu1 %vm4492_vm1, %v5899_v34 }
 0x196   : > { %4151 = vmatmul.mubr.msk.bf16.gmra.mxu0 %vm1120_vm4, %v4957_v41 }
 0x197   : > { %4154 = vmatprep.mubr.msk.bf16.mxu0 %vm4492_vm1, %v5899_v34 }
 0x19c   : > { %4117 = vmatmul.mubr.msk.bf16.gmra.mxu1 %vm1120_vm4, %v4950_v46 }
 0x19d   : > { %4120 = vmatprep.mubr.msk.bf16.mxu1 %vm4492_vm1, %v5899_v34 }
 0x19e   : > { %4155 = vmatmul.mubr.msk.bf16.gmra.mxu0 %vm1120_vm4, %v4971_v56 }
 0x19f   : > { %4158 = vmatprep.mubr.msk.bf16.mxu0 %vm4492_vm1, %v5899_v34 }
 0x1a4   : > { %4121 = vmatmul.mubr.msk.bf16.gmra.mxu1 %vm1120_vm4, %v4960_v62 }
 0x1a5   : > { %4124 = vmatprep.mubr.msk.bf16.mxu1 %vm4492_vm1, %v5899_v34 }
 0x1a6   : > { %4159 = vmatmul.mubr.msk.bf16.gmra.mxu0 %vm1120_vm4, %v4983_v63 }
 0x1a7   : > { %4162 = vmatprep.mubr.msk.bf16.mxu0 %vm4492_vm1, %v5899_v34 }
 0x1ac   : > { %4125 = vmatmul.mubr.msk.bf16.gmra.mxu1 %vm1120_vm4, %v4974_v1 }
 0x1ad   : > { %4128 = vmatprep.mubr.msk.bf16.mxu1 %vm4492_vm1, %v5899_v34 }
 0x1ae   : > { %4163 = vmatmul.mubr.msk.bf16.gmra.mxu0 %vm1120_vm4, %v4999_v3  ;;  %v2395_v3 = vld [vmem:[#allocation2 + $0x18] sm:$0xc] }
 0x1af   : > { %4166 = vmatprep.mubr.msk.bf16.mxu0 %vm4492_vm1, %v5899_v34 }
 0x1b4   : > { %4129 = vmatmul.mubr.msk.bf16.gmra.mxu1 %vm1120_vm4, %v4986_v31 }
 0x1b5   : > { %4132 = vmatprep.mubr.msk.bf16.mxu1 %vm4492_vm1, %v5899_v34 }
 0x1b6   : > { %4167 = vmatmul.mubr.msk.bf16.gmra.mxu0 %vm1120_vm4, %v5011_v38 }
 0x1b7   : > { %4170 = vmatprep.mubr.msk.bf16.mxu0 %vm4492_vm1, %v5899_v34 }
 0x1bc   : > { %v1182_v61 = vpop.f32.mrf.mxu1  ;;  %4133 = vmatmul.mubr.msk.bf16.gmra.mxu1 %vm1120_vm4, %v5002_v22 }
 0x1bd   : > { %4136 = vmatprep.mubr.msk.bf16.mxu1 %vm4492_vm1, %v5899_v34 }
 0x1be   : > { %v3958_v13 = vpop.f32.mrf.mxu1  ;;  %v1400_v33 = vpop.f32.mrf.mxu0  ;;  %4171 = vmatmul.mubr.msk.bf16.gmra.mxu0 %vm1120_vm4, %v5021_v24  ;;  %v3683_v24 = vcombine.low %v2395_v3, %v5064_v11  ;;  %v5917_v11 = vshrl.u32 %v5069_v42, 16  ;;  %v5920_v42 = vld [vmem:[#allocation3_spill] sm:$0xff] }
 0x1bf   : > { %v5337_v31 = vadd.f32 %v1400_v33, %v1182_v61  ;;  %4174 = vmatprep.mubr.msk.bf16.mxu0 %vm4492_vm1, %v5899_v34  ;;  %v5921_v57 = vshrl.u32 %v5920_v42, 16  ;;  %v5922_v61 = vshll.u32 %v5920_v42, 16 }
 0x1c0   : > { %v1185_v45 = vpop.f32.mrf.mxu1  ;;  %v3996_v46 = vpop.f32.mrf.mxu0  ;;  %v2466_v32 = vshrl.u32 %v3683_v24, 16  ;;  %v2476_v16 = vrot.slane %v5917_v11, 2 }
 0x1c1   : > { %v2485_v53 = vrot.slane %v5921_v57, 2  ;;  %v2488_v13 = vrot.slane %v5922_v61, 3 }
 0x1c2   : > { %v3959_v41 = vpop.f32.mrf.mxu1  ;;  %v1403_v62 = vpop.f32.mrf.mxu0  ;;  %v2468_v36 = vrot.slane %v2466_v32, 2  ;;  %v2480_v8 = vor.u32 %v2479_v48, %v2476_v16  ;;  %v5924_v32 = vshll.u32 %v5075_v0, 16 }
 0x1c3   : > { %v5341_v56 = vadd.f32 %v1403_v62, %v1185_v45 }
 0x1c4   : > { %v1190_v1 = vpop.f32.mrf.mxu1  ;;  %v3997_v63 = vpop.f32.mrf.mxu0  ;;  %4137 = vmatmul.mubr.msk.bf16.gmra.mxu1 %vm1120_vm4, %v5014_v15  ;;  %v2469_v15 = vshll.u32 %v3683_v24, 16  ;;  %v2721_v24 = vrot.slane %v5920_v42, 3 }
 0x1c5   : > { %4140 = vmatprep.mubr.msk.bf16.mxu1 %vm4492_vm1, %v5899_v34 }
 0x1c6   : > { %v3962_v22 = vpop.f32.mrf.mxu1  ;;  %v1408_v38 = vpop.f32.mrf.mxu0  ;;  %4175 = vmatmul.mubr.msk.bf16.gmra.mxu0 %vm1120_vm4, %v5028_v5  ;;  %v2471_v47 = vrot.slane %v2469_v15, 3  ;;  %v2497_v15 = vrot.slane %v5924_v32, 3  ;;  %v2722_v11 = vsel %vm2717_vm10, %v2719_v26, %v2721_v24  ;;  %v5925_v26 = vld [vmem:[#allocation5_spill] sm:$0xff] }
 0x1c7   : > { %v5350_v51 = vadd.f32 %v1408_v38, %v1190_v1  ;;  %4178 = vmatprep.mubr.msk.bf16.mxu0 %vm4492_vm1, %v5899_v34  ;;  %v2489_v1 = vor.u32 %v2488_v13, %v2485_v53 }
 0x1c8   : > { %v1193_v44 = vpop.f32.mrf.mxu1  ;;  %v4000_v2 = vpop.f32.mrf.mxu0  ;;  %v2472_v17 = vor.u32 %v2471_v47, %v2468_v36  ;;  %v2723_v47 = vrot.slane %v5075_v0, 3 }
 0x1c9   : > { %v2490_v38 = vsel %vm2189_vm8, %v2480_v8, %v2489_v1 }
 0x1ca   : > { %v3963_v37 = vpop.f32.mrf.mxu1  ;;  %v1411_v59 = vpop.f32.mrf.mxu0 }
 0x1cb   : > { %v5354_v10 = vadd.f32 %v1411_v59, %v1193_v44  ;;  %v5923_v44 = vshrl.u32 %v5075_v0, 16  ;;  %v5927_v0 = vshll.u32 %v5925_v26, 16 }
 0x1cc   : > { %v1198_v5 = vpop.f32.mrf.mxu1  ;;  %v4001_v50 = vpop.f32.mrf.mxu0  ;;  %4141 = vmatmul.mubr.msk.bf16.gmra.mxu1 %vm1120_vm4, %v5024_v55  ;;  %v4438_v55 = vld [vmem:[%s5858_s4 + $0x40] sm:$0xff]  }
 0x1cd   : > { %4184 = vmatprep.mubr.msk.bf16.mxu1 %vm4492_vm1, %v5899_v34  ;;  %v2494_v2 = vrot.slane %v5923_v44, 2 }
 0x1ce   : > { %v3966_v54 = vpop.f32.mrf.mxu1  ;;  %v1416_v49 = vpop.f32.mrf.mxu0  ;;  %4179 = vmatmul.mubr.msk.bf16.gmra.mxu0 %vm1120_vm4, %v5043_v18  ;;  %v2481_v18 = vsel %vm2189_vm8, %v2472_v17, %v2480_v8 }
 0x1cf   : > { %v5366_v20 = vadd.f32 %v1416_v49, %v1198_v5  ;;  %4222 = vmatprep.mubr.msk.bf16.mxu0 %vm4492_vm1, %v5899_v34  ;;  %v2498_v5 = vor.u32 %v2497_v15, %v2494_v2 }
 0x1d0   : > { %v1201_v40 = vpop.f32.mrf.mxu1  ;;  %v4004_v35 = vpop.f32.mrf.mxu0 }
 0x1d2   : > { %v3967_v28 = vpop.f32.mrf.mxu1  ;;  %v1419_v23 = vpop.f32.mrf.mxu0 }
 0x1d3   : > { %v5374_v21 = vadd.f32 %v1419_v23, %v1201_v40  ;;  %v2499_v40 = vsel %vm2189_vm8, %v2489_v1, %v2498_v5  ;;  %v5926_v28 = vshrl.u32 %v5925_v26, 16  ;;  %v5928_v1 = vshrl.u32 %v5082_v27, 16 }
 0x1d4   : > { %v1206_v29 = vpop.f32.mrf.mxu1  ;;  %v4005_v43 = vpop.f32.mrf.mxu0  ;;  %4185 = vmatmul.mubr.msk.bf16.vlgmr.msra.gmra.mxu1 %vm1120_vm4, %v2481_v18  ;;  %v2506_v18 = vrot.slane %v5927_v0, 3  ;;  %v2729_v0 = vrot.slane %v5087_v39, 3 }
 0x1d5   : > { %4259 = vmatpush3.bf16.msra.mxu1 %v4438_v55  ;;  %4188 = vmatprep.mubr.msk.bf16.mxu1 %vm4492_vm1, %v5899_v34  ;;  %v2724_v55 = vsel %vm2717_vm10, %v2721_v24, %v2723_v47  ;;  %v2503_v23 = vrot.slane %v5926_v28, 2 }
 0x1d6   : > { %v3970_v33 = vpop.f32.mrf.mxu1  ;;  %v1424_v45 = vpop.f32.mrf.mxu0  ;;  %4223 = vmatmul.mubr.msk.bf16.vlgmr.msra.gmra.mxu0 %vm1120_vm4, %v2720_v25 }
 0x1d7   : > { %v5387_v46 = vadd.f32 %v1424_v45, %v1206_v29  ;;  %4226 = vmatprep.mubr.msk.bf16.mxu0 %vm4492_vm1, %v5899_v34  ;;  %v2507_v42 = vor.u32 %v2506_v18, %v2503_v23  ;;  %v2725_v33 = vrot.slane %v5925_v26, 3 }
 0x1d8   : > { %v1209_v41 = vpop.f32.mrf.mxu1  ;;  %v4008_v62 = vpop.f32.mrf.mxu0 }
 0x1d9   : > { %v2508_v13 = vsel %vm2189_vm8, %v2498_v5, %v2507_v42  ;;  %v2726_v62 = vsel %vm2717_vm10, %v2723_v47, %v2725_v33  ;;  %v5931_v47 = vshll.u32 %v5087_v39, 16 }
 0x1da   : > { %v3971_v63 = vpop.f32.mrf.mxu1  ;;  %v1427_v3 = vpop.f32.mrf.mxu0 }
 0x1db   : > { %v5392_v22 = vadd.f32 %v1427_v3, %v1209_v41  ;;  %v2512_v63 = vrot.slane %v5928_v1, 2  ;;  %v5929_v3 = vshll.u32 %v5082_v27, 16 }
 0x1dc   : > { %v1214_v37 = vpop.f32.mrf.mxu1  ;;  %v4009_v59 = vpop.f32.mrf.mxu0  ;;  %4189 = vmatmul.mubr.msk.bf16.gmra.mxu1 %vm1120_vm4, %v2490_v38 }
 0x1dd   : > { %4192 = vmatprep.mubr.msk.bf16.mxu1 %vm4492_vm1, %v5899_v34  ;;  %v2515_v24 = vrot.slane %v5929_v3, 3 }
 0x1de   : > { %v3974_v16 = vpop.f32.mrf.mxu1  ;;  %v1432_v6 = vpop.f32.mrf.mxu0  ;;  %4227 = vmatmul.mubr.msk.bf16.gmra.mxu0 %vm1120_vm4, %v2722_v11 }
 0x1df   : > { %v5404_v48 = vadd.f32 %v1432_v6, %v1214_v37  ;;  %4230 = vmatprep.mubr.msk.bf16.mxu0 %vm4492_vm1, %v5899_v34  ;;  %v2516_v37 = vor.u32 %v2515_v24, %v2512_v63  ;;  %v2727_v16 = vrot.slane %v5082_v27, 3  ;;  %v2731_v24 = vrot.slane %v5094_v30, 3 }
 0x1e0   : > { %v1217_v50 = vpop.f32.mrf.mxu1  ;;  %v4012_v36 = vpop.f32.mrf.mxu0 }
 0x1e1   : > { %v2517_v5 = vsel %vm2189_vm8, %v2507_v42, %v2516_v37 }
 0x1e2   : > { %v3975_v54 = vpop.f32.mrf.mxu1  ;;  %v1435_v49 = vpop.f32.mrf.mxu0 }
 0x1e3   : > { %v5409_v8 = vadd.f32 %v1435_v49, %v1217_v50  ;;  %v5930_v50 = vshrl.u32 %v5087_v39, 16  ;;  %v2524_v54 = vrot.slane %v5931_v47, 3 }
 0x1e4   : > { %v1222_v35 = vpop.f32.mrf.mxu1  ;;  %v4013_v17 = vpop.f32.mrf.mxu0  ;;  %4193 = vmatmul.mubr.msk.bf16.gmra.mxu1 %vm1120_vm4, %v2499_v40 }
 0x1e5   : > { %4196 = vmatprep.mubr.msk.bf16.mxu1 %vm4492_vm1, %v5899_v34  ;;  %v2521_v36 = vrot.slane %v5930_v50, 2 }
 0x1e6   : > { %v3978_v12 = vpop.f32.mrf.mxu1  ;;  %v1440_v4 = vpop.f32.mrf.mxu0  ;;  %4231 = vmatmul.mubr.msk.bf16.gmra.mxu0 %vm1120_vm4, %v2724_v55 }
 0x1e7   : > { %v5421_v29 = vadd.f32 %v1440_v4, %v1222_v35  ;;  %4234 = vmatprep.mubr.msk.bf16.mxu0 %vm4492_vm1, %v5899_v34  ;;  %v2728_v35 = vsel %vm2717_vm10, %v2725_v33, %v2727_v16  ;;  %v2525_v26 = vor.u32 %v2524_v54, %v2521_v36  ;;  %v5935_v36 = vshll.u32 %v5103_v14, 16 }
 0x1e8   : > { %v1225_v43 = vpop.f32.mrf.mxu1  ;;  %v4016_v25 = vpop.f32.mrf.mxu0 }
 0x1e9   : > { %v5932_v25 = vshrl.u32 %v5094_v30, 16  ;;  %v2542_v47 = vrot.slane %v5935_v36, 3 }
 0x1ea   : > { %v3979_v57 = vpop.f32.mrf.mxu1  ;;  %v1443_v53 = vpop.f32.mrf.mxu0 }
 0x1eb   : > { %v5425_v61 = vadd.f32 %v1443_v53, %v1225_v43  ;;  %v2526_v43 = vsel %vm2189_vm8, %v2516_v37, %v2525_v26  ;;  %v2530_v42 = vrot.slane %v5932_v25, 2  ;;  %v5933_v57 = vshll.u32 %v5094_v30, 16  ;;  %v4447_v37 = vld [vmem:[#allocation2 + $0x60] ss:$0 sps:$4 sm:$0x77]  }
 0x1ec   : > { %v1230_v45 = vpop.f32.mrf.mxu1  ;;  %v4017_v41 = vpop.f32.mrf.mxu0  ;;  %4197 = vmatmul.mubr.msk.bf16.gmra.mxu1 %vm1120_vm4, %v2508_v13  ;;  %v5934_v30 = vshrl.u32 %v5103_v14, 16 }
 0x1ed   : > { %4200 = vmatprep.mubr.msk.bf16.mxu1 %vm4492_vm1, %v5899_v34  ;;  %v2533_v53 = vrot.slane %v5933_v57, 3 }
 0x1ee   : > { %v3982_v38 = vpop.f32.mrf.mxu1  ;;  %v1448_v44 = vpop.f32.mrf.mxu0  ;;  %4235 = vmatmul.mubr.msk.bf16.gmra.mxu0 %vm1120_vm4, %v2726_v62  ;;  %v2539_v50 = vrot.slane %v5934_v30, 2 }
 0x1ef   : > { %v5438_v2 = vadd.f32 %v1448_v44, %v1230_v45  ;;  %4238 = vmatprep.mubr.msk.bf16.mxu0 %vm4492_vm1, %v5899_v34  ;;  %v2730_v45 = vsel %vm2717_vm10, %v2727_v16, %v2729_v0  ;;  %v2534_v1 = vor.u32 %v2533_v53, %v2530_v42 }
 0x1f0   : > { %v1233_v32 = vpop.f32.mrf.mxu1  ;;  %v4020_v15 = vpop.f32.mrf.mxu0 }
 0x1f1   : > { %v2535_v15 = vsel %vm2189_vm8, %v2525_v26, %v2534_v1 }
 0x1f2   : > { %v3983_v59 = vpop.f32.mrf.mxu1  ;;  %v1451_v11 = vpop.f32.mrf.mxu0 }
 0x1f3   : > { %v5443_v6 = vadd.f32 %v1451_v11, %v1233_v32 }
 0x1f4   : > { %v1238_v49 = vpop.f32.mrf.mxu1  ;;  %v4021_v40 = vpop.f32.mrf.mxu0  ;;  %4201 = vmatmul.mubr.msk.bf16.gmra.mxu1 %vm1120_vm4, %v2517_v5  ;;  %v2732_v5 = vsel %vm2717_vm10, %v2729_v0, %v2731_v24 }
 0x1f5   : > { %4204 = vmatprep.mubr.msk.bf16.mxu1 %vm4492_vm1, %v5899_v34 }
 0x1f6   : > { %v3986_v27 = vpop.f32.mrf.mxu1  ;;  %v1456_v17 = vpop.f32.mrf.mxu0  ;;  %4239 = vmatmul.mubr.msk.bf16.gmra.mxu0 %vm1120_vm4, %v2728_v35  ;;  %v2549_v35 = vshll.u32 %v4447_v37, 16 }
 0x1f7   : > { %v5455_v55 = vadd.f32 %v1456_v17, %v1238_v49  ;;  %4242 = vmatprep.mubr.msk.bf16.mxu0 %vm4492_vm1, %v5899_v34 }
 0x1f8   : > { %v1241_v28 = vpop.f32.mrf.mxu1  ;;  %v4024_v23 = vpop.f32.mrf.mxu0  ;;  %v2551_v42 = vrot.slane %v2549_v35, 3 }
 0x1fa   : > { %v3987_v18 = vpop.f32.mrf.mxu1  ;;  %v1459_v12 = vpop.f32.mrf.mxu0 }
 0x1fb   : > { %v5460_v4 = vadd.f32 %v1459_v12, %v1241_v28  ;;  %v2543_v28 = vor.u32 %v2542_v47, %v2539_v50  ;;  %v2733_v18 = vrot.slane %v5103_v14, 3 }
 0x1fc   : > { %v1246_v13 = vpop.f32.mrf.mxu1  ;;  %v4025_v33 = vpop.f32.mrf.mxu0  ;;  %4205 = vmatmul.mubr.msk.bf16.gmra.mxu1 %vm1120_vm4, %v2526_v43 }
 0x1fd   : > { %4208 = vmatprep.mubr.msk.bf16.mxu1 %vm4492_vm1, %v5899_v34  ;;  %v2544_v43 = vsel %vm2189_vm8, %v2534_v1, %v2543_v28  ;;  %v2734_v33 = vsel %vm2717_vm10, %v2731_v24, %v2733_v18 }
 0x1fe   : > { %v3990_v39 = vpop.f32.mrf.mxu1  ;;  %v1464_v41 = vpop.f32.mrf.mxu0  ;;  %4243 = vmatmul.mubr.msk.bf16.gmra.mxu0 %vm1120_vm4, %v2730_v45 }
 0x1ff   : > { %v5472_v62 = vadd.f32 %v1464_v41, %v1246_v13  ;;  %4246 = vmatprep.mubr.msk.bf16.mxu0 %vm4492_vm1, %v5899_v34 }
 0x200   : > { %v1249_v63 = vpop.f32.mrf.mxu1  ;;  %v4028_v3 = vpop.f32.mrf.mxu0 }
 0x202   : > { %v3991_v38 = vpop.f32.mrf.mxu1  ;;  %v1467_v44 = vpop.f32.mrf.mxu0 }
 0x203   : > { %v5477_v32 = vadd.f32 %v1467_v44, %v1249_v63 }
 0x204   : > { %v4029_v59 = vpop.f32.mrf.mxu0  ;;  %v1595_v11 = vpop.f32.mrf.mxu1  ;;  %4209 = vmatmul.mubr.msk.bf16.gmra.mxu1 %vm1120_vm4, %v2535_v15 }
 0x205   : > { %v1666_v16 = vadd.f32 %v1595_v11, %v5337_v31  ;;  %4212 = vmatprep.mubr.msk.bf16.mxu1 %vm4492_vm1, %v5899_v34  ;;  %v2546_v31 = vshrl.u32 %v4447_v37, 16 }
 0x206   : > { %v4034_v54 = vpop.f32.mrf.mxu1  ;;  %v1910_v49 = vpop.f32.mrf.mxu0  ;;  %4247 = vmatmul.mubr.msk.bf16.gmra.mxu0 %vm1120_vm4, %v2732_v5 }
 0x207   : > { %v5490_v40 = vadd.f32 %v1910_v49, %v1666_v16  ;;  %4250 = vmatprep.mubr.msk.bf16.mxu0 %vm4492_vm1, %v5899_v34  ;;  %v2548_v25 = vrot.slane %v2546_v31, 2 }
 0x208   : > { %v1598_v27 = vpop.f32.mrf.mxu1  ;;  %v4072_v17 = vpop.f32.mrf.mxu0 }
 0x209   : > { %v1667_v26 = vadd.f32 %v1598_v27, %v5341_v56  ;;  %v2552_v39 = vor.u32 %v2551_v42, %v2548_v25 }
 0x20a   : > { %v4035_v23 = vpop.f32.mrf.mxu1  ;;  %v1913_v0 = vpop.f32.mrf.mxu0 }
 0x20b   : > { %v5496_v12 = vadd.f32 %v1913_v0, %v1667_v26  ;;  %v2553_v44 = vsel %vm2189_vm8, %v2543_v28, %v2552_v39  ;;  %v4449_v0 = vld [vmem:[%s5860_s6] sm:$0xff]  }
 0x20c   : > { %v1603_v57 = vpop.f32.mrf.mxu1  ;;  %v4073_v53 = vpop.f32.mrf.mxu0  ;;  %4213 = vmatmul.mubr.msk.bf16.gmra.mxu1 %vm1120_vm4, %v2544_v43  ;;  %4297 = vmatpush3.bf16.msra.mxu0 %v4449_v0 }
 0x20d   : > { %v1668_v13 = vadd.f32 %v1603_v57, %v5350_v51  ;;  %4216 = vmatprep.mubr.msk.bf16.mxu1 %vm4492_vm1, %v5899_v34  ;;  %v2735_v51 = vrot.slane %v4447_v37, 3 }
 0x20e   : > { %v4038_v56 = vpop.f32.mrf.mxu1  ;;  %v1918_v45 = vpop.f32.mrf.mxu0  ;;  %4251 = vmatmul.mubr.msk.bf16.gmra.mxu0 %vm1120_vm4, %v2734_v33 }
 0x20f   : > { %v5505_v14 = vadd.f32 %v1918_v45, %v1668_v13  ;;  %4254 = vmatprep.mubr.msk.bf16.mxu0 %vm4492_vm1, %v5899_v34  ;;  %v2736_v16 = vsel %vm2717_vm10, %v2733_v18, %v2735_v51 }
 0x210   : > { %v1606_v41 = vpop.f32.mrf.mxu1  ;;  %v4076_v1 = vpop.f32.mrf.mxu0 }
 0x211   : > { %v1669_v63 = vadd.f32 %v1606_v41, %v5354_v10 }
 0x212   : > { %v4039_v3 = vpop.f32.mrf.mxu1  ;;  %v1921_v24 = vpop.f32.mrf.mxu0 }
 0x213   : > { %v5510_v38 = vadd.f32 %v1921_v24, %v1669_v63 }
 0x214   : > { %v1611_v15 = vpop.f32.mrf.mxu1  ;;  %v4077_v59 = vpop.f32.mrf.mxu0  ;;  %4217 = vmatmul.mubr.msk.bf16.gmra.mxu1 %vm1120_vm4, %v2553_v44 }
 0x215   : > { %v1670_v11 = vadd.f32 %v1611_v15, %v5366_v20  ;;  %4260 = vmatprep.mubr.msk.bf16.mxu1 %vm4492_vm1, %v5899_v34 }
 0x216   : > { %v4042_v5 = vpop.f32.mrf.mxu1  ;;  %v1926_v10 = vpop.f32.mrf.mxu0  ;;  %4255 = vmatmul.mubr.msk.bf16.gmra.mxu0 %vm1120_vm4, %v2736_v16 }
 0x217   : > { %v5519_v37 = vadd.f32 %v1926_v10, %v1670_v11  ;;  %4298 = vmatprep.mubr.msk.bf16.mxu0 %vm4492_vm1, %v5899_v34 }
 0x218   : > { %v1614_v30 = vpop.f32.mrf.mxu1  ;;  %v4080_v50 = vpop.f32.mrf.mxu0 }
 0x219   : > { %v1671_v36 = vadd.f32 %v1614_v30, %v5374_v21  ;;  %v5937_v30 = vld [vmem:[#allocation7_spill] sm:$0xff] }
 0x21a   : > { %v4043_v47 = vpop.f32.mrf.mxu1  ;;  %v1929_v20 = vpop.f32.mrf.mxu0 }
 0x21b   : > { %v5524_v54 = vadd.f32 %v1929_v20, %v1671_v36 }
 0x21c   : > { %v1619_v49 = vpop.f32.mrf.mxu1  ;;  %v4081_v31 = vpop.f32.mrf.mxu0  ;;  %4261 = vmatmul.mubr.msk.bf16.vlgmr.msra.gmra.mxu1 %vm1120_vm4, %v5147_v9 }
 0x21d   : > { %v1672_v35 = vadd.f32 %v1619_v49, %v5387_v46  ;;  %4264 = vmatprep.mubr.msk.bf16.mxu1 %vm4492_vm1, %v5899_v34 }
 0x21e   : > { %v4046_v27 = vpop.f32.mrf.mxu1  ;;  %v1934_v17 = vpop.f32.mrf.mxu0 }
 0x21f   : > { %v5531_v26 = vadd.f32 %v1934_v17, %v1672_v35 }
 0x220   : > { %v1622_v28 = vpop.f32.mrf.mxu1  ;;  %v4084_v21 = vpop.f32.mrf.mxu0 }
 0x221   : > { %v1673_v23 = vadd.f32 %v1622_v28, %v5392_v22  ;;  %v5938_v21 = vld [vmem:[#allocation8_spill] sm:$0xff] }
 0x222   : > { %v4047_v18 = vpop.f32.mrf.mxu1  ;;  %v1937_v43 = vpop.f32.mrf.mxu0 }
 0x223   : > { %v5537_v9 = vadd.f32 %v1937_v43, %v1673_v23 }
 0x224   : > { %v1627_v46 = vpop.f32.mrf.mxu1  ;;  %v4085_v25 = vpop.f32.mrf.mxu0  ;;  %4265 = vmatmul.mubr.msk.bf16.gmra.mxu1 %vm1120_vm4, %v5156_v19  ;;  %v5936_v19 = vld [vmem:[#allocation6_spill] sm:$0xff] }
 0x225   : > { %v1674_v42 = vadd.f32 %v1627_v46, %v5404_v48  ;;  %4268 = vmatprep.mubr.msk.bf16.mxu1 %vm4492_vm1, %v5899_v34 }
 0x226   : > { %v4050_v22 = vpop.f32.mrf.mxu1  ;;  %v1942_v57 = vpop.f32.mrf.mxu0 }
 0x227   : > { %v5544_v53 = vadd.f32 %v1942_v57, %v1674_v42 }
 0x228   : > { %v1630_v13 = vpop.f32.mrf.mxu1  ;;  %v4088_v33 = vpop.f32.mrf.mxu0 }
 0x229   : > { %v1675_v56 = vadd.f32 %v1630_v13, %v5409_v8 }
 0x22a   : > { %v4051_v45 = vpop.f32.mrf.mxu1  ;;  %v1945_v39 = vpop.f32.mrf.mxu0 }
 0x22b   : > { %v5547_v41 = vadd.f32 %v1945_v39, %v1675_v56 }
 0x22c   : > { %v1635_v1 = vpop.f32.mrf.mxu1  ;;  %v4089_v63 = vpop.f32.mrf.mxu0  ;;  %4269 = vmatmul.mubr.msk.bf16.gmra.mxu1 %vm1120_vm4, %v5936_v19 }
 0x22d   : > { %v1676_v48 = vadd.f32 %v1635_v1, %v5421_v29  ;;  %4272 = vmatprep.mubr.msk.bf16.mxu1 %vm4492_vm1, %v5899_v34 }
 0x22e   : > { %v4054_v51 = vpop.f32.mrf.mxu1  ;;  %v1950_v3 = vpop.f32.mrf.mxu0 }
 0x22f   : > { %v5554_v24 = vadd.f32 %v1950_v3, %v1676_v48 }
 0x230   : > { %v1638_v44 = vpop.f32.mrf.mxu1  ;;  %v4092_v8 = vpop.f32.mrf.mxu0 }
 0x231   : > { %v1677_v15 = vadd.f32 %v1638_v44, %v5425_v61 }
 0x232   : > { %v4055_v59 = vpop.f32.mrf.mxu1  ;;  %v1953_v11 = vpop.f32.mrf.mxu0 }
 0x233   : > { %v5557_v16 = vadd.f32 %v1953_v11, %v1677_v15 }
 0x234   : > { %v1643_v5 = vpop.f32.mrf.mxu1  ;;  %v4093_v10 = vpop.f32.mrf.mxu0  ;;  %4273 = vmatmul.mubr.msk.bf16.gmra.mxu1 %vm1120_vm4, %v5937_v30 }
 0x235   : > { %v1678_v29 = vadd.f32 %v1643_v5, %v5438_v2  ;;  %4276 = vmatprep.mubr.msk.bf16.mxu1 %vm4492_vm1, %v5899_v34 }
 0x236   : > { %v4058_v50 = vpop.f32.mrf.mxu1  ;;  %v1958_v36 = vpop.f32.mrf.mxu0 }
 0x237   : > { %v5564_v47 = vadd.f32 %v1958_v36, %v1678_v29 }
 0x238   : > { %v1646_v20 = vpop.f32.mrf.mxu1  ;;  %v4096_v61 = vpop.f32.mrf.mxu0 }
 0x239   : > { %v1679_v49 = vadd.f32 %v1646_v20, %v5443_v6 }
 0x23a   : > { %v4059_v31 = vpop.f32.mrf.mxu1  ;;  %v1961_v35 = vpop.f32.mrf.mxu0 }
 0x23b   : > { %v5567_v27 = vadd.f32 %v1961_v35, %v1679_v49 }
 0x23c   : > { %v1651_v17 = vpop.f32.mrf.mxu1  ;;  %v4097_v28 = vpop.f32.mrf.mxu0  ;;  %4277 = vmatmul.mubr.msk.bf16.gmra.mxu1 %vm1120_vm4, %v5938_v21 }
 0x23d   : > { %v1680_v2 = vadd.f32 %v1651_v17, %v5455_v55  ;;  %4280 = vmatprep.mubr.msk.bf16.mxu1 %vm4492_vm1, %v5899_v34 }
 0x23e   : > { %v4062_v23 = vpop.f32.mrf.mxu1  ;;  %v1966_v0 = vpop.f32.mrf.mxu0 }
 0x23f   : > { %v5574_v18 = vadd.f32 %v1966_v0, %v1680_v2 }
 0x240   : > { %v1654_v43 = vpop.f32.mrf.mxu1  ;;  %v4100_v6 = vpop.f32.mrf.mxu0 }
 0x241   : > { %v1681_v46 = vadd.f32 %v1654_v43, %v5460_v4 }
 0x242   : > { %v4063_v25 = vpop.f32.mrf.mxu1  ;;  %v1969_v42 = vpop.f32.mrf.mxu0 }
 0x243   : > { %v5577_v22 = vadd.f32 %v1969_v42, %v1681_v46 }
 0x244   : > { %v1659_v57 = vpop.f32.mrf.mxu1  ;;  %v4101_v13 = vpop.f32.mrf.mxu0  ;;  %4281 = vmatmul.mubr.msk.bf16.gmra.mxu1 %vm1120_vm4, %v5185_v52 }
 0x245   : > { %v1682_v55 = vadd.f32 %v1659_v57, %v5472_v62  ;;  %4284 = vmatprep.mubr.msk.bf16.mxu1 %vm4492_vm1, %v5899_v34 }
 0x246   : > { %v4066_v33 = vpop.f32.mrf.mxu1  ;;  %v1974_v56 = vpop.f32.mrf.mxu0 }
 0x247   : > { %v5584_v45 = vadd.f32 %v1974_v56, %v1682_v55 }
 0x248   : > { %v1662_v39 = vpop.f32.mrf.mxu1  ;;  %v4104_v4 = vpop.f32.mrf.mxu0 }
 0x249   : > { %v1683_v1 = vadd.f32 %v1662_v39, %v5477_v32 }
 0x24a   : > { %v4067_v63 = vpop.f32.mrf.mxu1  ;;  %v1977_v19 = vpop.f32.mrf.mxu0 }
 0x24b   : > { %v5587_v48 = vadd.f32 %v1977_v19, %v1683_v1 }
 0x24c   : > { %v4105_v51 = vpop.f32.mrf.mxu0  ;;  %v2093_v3 = vpop.f32.mrf.mxu1  ;;  %4285 = vmatmul.mubr.msk.bf16.gmra.mxu1 %vm1120_vm4, %v5188_v58 }
 0x24d   : > { %v2164_v52 = vadd.f32 %v2093_v3, %v5490_v40  ;;  %4288 = vmatprep.mubr.msk.bf16.mxu1 %vm4492_vm1, %v5899_v34 }
 0x24e   : > { %v4110_v62 = vpop.f32.mrf.mxu1  ;;  %v2306_v44 = vpop.f32.mrf.mxu0 }
 0x24f   : > { %v5594_v8 = vadd.f32 %v2306_v44, %v2164_v52 }
 0x250   : > { %v2096_v15 = vpop.f32.mrf.mxu1  ;;  %v4148_v32 = vpop.f32.mrf.mxu0 }
 0x251   : > { %v2165_v59 = vadd.f32 %v2096_v15, %v5496_v12 }
 0x252   : > { %v4111_v11 = vpop.f32.mrf.mxu1  ;;  %v2309_v5 = vpop.f32.mrf.mxu0 }
 0x253   : > { %v5597_v10 = vadd.f32 %v2309_v5, %v2165_v59 }
 0x254   : > { %v2101_v30 = vpop.f32.mrf.mxu1  ;;  %v4149_v29 = vpop.f32.mrf.mxu0  ;;  %4289 = vmatmul.mubr.msk.bf16.gmra.mxu1 %vm1120_vm4, %v5191_v60 }
 0x255   : > { %v2166_v58 = vadd.f32 %v2101_v30, %v5505_v14  ;;  %4292 = vmatprep.mubr.msk.bf16.mxu1 %vm4492_vm1, %v5899_v34 }
 0x256   : > { %v4114_v40 = vpop.f32.mrf.mxu1  ;;  %v2314_v50 = vpop.f32.mrf.mxu0 }
 0x257   : > { %v5604_v36 = vadd.f32 %v2314_v50, %v2166_v58 }
 0x258   : > { %v2104_v20 = vpop.f32.mrf.mxu1  ;;  %v4152_v12 = vpop.f32.mrf.mxu0 }
 0x259   : > { %v2167_v61 = vadd.f32 %v2104_v20, %v5510_v38 }
 0x25a   : > { %v4115_v49 = vpop.f32.mrf.mxu1  ;;  %v2317_v31 = vpop.f32.mrf.mxu0 }
 0x25b   : > { %v5607_v35 = vadd.f32 %v2317_v31, %v2167_v61 }
 0x25c   : > { %v2109_v17 = vpop.f32.mrf.mxu1  ;;  %v4153_v28 = vpop.f32.mrf.mxu0  ;;  %4293 = vmatmul.mubr.msk.bf16.gmra.mxu1 %vm1120_vm4, %v5196_v7 }
 0x25d   : > { %v2168_v60 = vadd.f32 %v2109_v17, %v5519_v37 }
 0x25e   : > { %v4118_v14 = vpop.f32.mrf.mxu1  ;;  %v2322_v21 = vpop.f32.mrf.mxu0 }
 0x25f   : > { %v5612_v2 = vadd.f32 %v2322_v21, %v2168_v60 }
 0x260   : > { %v2112_v23 = vpop.f32.mrf.mxu1  ;;  %v4156_v0 = vpop.f32.mrf.mxu0 }
 0x261   : > { %v2169_v43 = vadd.f32 %v2112_v23, %v5524_v54 }
 0x262   : > { %v4119_v38 = vpop.f32.mrf.mxu1  ;;  %v2325_v6 = vpop.f32.mrf.mxu0 }
 0x263   : > { %v5615_v46 = vadd.f32 %v2325_v6, %v2169_v43 }
 0x264   : > { %v2117_v25 = vpop.f32.mrf.mxu1  ;;  %v4157_v42 = vpop.f32.mrf.mxu0 }
 0x265   : > { %v2170_v57 = vadd.f32 %v2117_v25, %v5531_v26 }
 0x266   : > { %v4122_v13 = vpop.f32.mrf.mxu1  ;;  %v2330_v7 = vpop.f32.mrf.mxu0 }
 0x267   : > { %v5618_v55 = vadd.f32 %v2330_v7, %v2170_v57 }
 0x268   : > { %v2120_v37 = vpop.f32.mrf.mxu1  ;;  %v4160_v33 = vpop.f32.mrf.mxu0 }
 0x269   : > { %v2171_v56 = vadd.f32 %v2120_v37, %v5537_v9 }
 0x26a   : > { %v4123_v39 = vpop.f32.mrf.mxu1  ;;  %v2333_v4 = vpop.f32.mrf.mxu0 }
 0x26b   : > { %v5621_v1 = vadd.f32 %v2333_v4, %v2171_v56 }
 0x26c   : > { %v2125_v54 = vpop.f32.mrf.mxu1  ;;  %v4161_v63 = vpop.f32.mrf.mxu0 }
 0x26d   : > { %v2172_v19 = vadd.f32 %v2125_v54, %v5544_v53 }
 0x26e   : > { %v4126_v51 = vpop.f32.mrf.mxu1  ;;  %v2338_v3 = vpop.f32.mrf.mxu0 }
 0x26f   : > { %v5624_v52 = vadd.f32 %v2338_v3, %v2172_v19 }
 0x270   : > { %v2128_v26 = vpop.f32.mrf.mxu1  ;;  %v4164_v62 = vpop.f32.mrf.mxu0 }
 0x271   : > { %v2173_v44 = vadd.f32 %v2128_v26, %v5547_v41 }
 0x272   : > { %v4127_v15 = vpop.f32.mrf.mxu1  ;;  %v2341_v32 = vpop.f32.mrf.mxu0 }
 0x273   : > { %v5627_v59 = vadd.f32 %v2341_v32, %v2173_v44 }
 0x274   : > { %v2133_v9 = vpop.f32.mrf.mxu1  ;;  %v4165_v11 = vpop.f32.mrf.mxu0 }
 0x275   : > { %v2174_v5 = vadd.f32 %v2133_v9, %v5554_v24 }
 0x276   : > { %v4130_v30 = vpop.f32.mrf.mxu1  ;;  %v2346_v29 = vpop.f32.mrf.mxu0 }
 0x277   : > { %v5630_v58 = vadd.f32 %v2346_v29, %v2174_v5 }
 0x278   : > { %v2136_v53 = vpop.f32.mrf.mxu1  ;;  %v4168_v40 = vpop.f32.mrf.mxu0 }
 0x279   : > { %v2175_v50 = vadd.f32 %v2136_v53, %v5557_v16 }
 0x27a   : > { %v4131_v20 = vpop.f32.mrf.mxu1  ;;  %v2349_v12 = vpop.f32.mrf.mxu0 }
 0x27b   : > { %v5633_v61 = vadd.f32 %v2349_v12, %v2175_v50 }
 0x27c   : > { %v2141_v41 = vpop.f32.mrf.mxu1  ;;  %v4169_v49 = vpop.f32.mrf.mxu0 }
 0x27d   : > { %v2176_v31 = vadd.f32 %v2141_v41, %v5564_v47 }
 0x27e   : > { %v4134_v17 = vpop.f32.mrf.mxu1  ;;  %v2354_v28 = vpop.f32.mrf.mxu0 }
 0x27f   : > { %v5636_v60 = vadd.f32 %v2354_v28, %v2176_v31 }
 0x280   : > { %v2144_v24 = vpop.f32.mrf.mxu1  ;;  %v4172_v14 = vpop.f32.mrf.mxu0 }
 0x281   : > { %v2177_v21 = vadd.f32 %v2144_v24, %v5567_v27 }
 0x282   : > { %v4135_v23 = vpop.f32.mrf.mxu1  ;;  %v2357_v0 = vpop.f32.mrf.mxu0 }
 0x283   : > { %v5639_v43 = vadd.f32 %v2357_v0, %v2177_v21 }
 0x284   : > { %v2149_v16 = vpop.f32.mrf.mxu1  ;;  %v4173_v38 = vpop.f32.mrf.mxu0 }
 0x285   : > { %v2178_v6 = vadd.f32 %v2149_v16, %v5574_v18 }
 0x286   : > { %v4138_v25 = vpop.f32.mrf.mxu1  ;;  %v2362_v42 = vpop.f32.mrf.mxu0 }
 0x287   : > { %v5642_v57 = vadd.f32 %v2362_v42, %v2178_v6 }
 0x288   : > { %v2152_v47 = vpop.f32.mrf.mxu1  ;;  %v4176_v13 = vpop.f32.mrf.mxu0 }
 0x289   : > { %v2179_v7 = vadd.f32 %v2152_v47, %v5577_v22 }
 0x28a   : > { %v4139_v37 = vpop.f32.mrf.mxu1  ;;  %v2365_v33 = vpop.f32.mrf.mxu0 }
 0x28b   : > { %v5645_v56 = vadd.f32 %v2365_v33, %v2179_v7 }
 0x28c   : > { %v2157_v27 = vpop.f32.mrf.mxu1  ;;  %v4177_v39 = vpop.f32.mrf.mxu0 }
 0x28d   : > { %v2180_v4 = vadd.f32 %v2157_v27, %v5584_v45 }
 0x28e   : > { %v4142_v54 = vpop.f32.mrf.mxu1  ;;  %v2370_v63 = vpop.f32.mrf.mxu0 }
 0x28f   : > { %v5648_v19 = vadd.f32 %v2370_v63, %v2180_v4 }
 0x290   : > { %v2160_v18 = vpop.f32.mrf.mxu1  ;;  %v4180_v51 = vpop.f32.mrf.mxu0 }
 0x291   : > { %v2181_v3 = vadd.f32 %v2160_v18, %v5587_v48 }
 0x292   : > { %v4143_v26 = vpop.f32.mrf.mxu1  ;;  %v2373_v62 = vpop.f32.mrf.mxu0 }
 0x293   : > { %v5651_v44 = vadd.f32 %v2373_v62, %v2181_v3 }
 0x294   : > { %v4181_v22 = vpop.f32.mrf.mxu0  ;;  %v2621_v15 = vpop.f32.mrf.mxu1 }
 0x295   : > { %v2692_v32 = vadd.f32 %v2621_v15, %v5594_v8 }
 0x296   : > { %v4186_v9 = vpop.f32.mrf.mxu1  ;;  %v2804_v11 = vpop.f32.mrf.mxu0 }
 0x297   : > { %v5654_v5 = vadd.f32 %v2804_v11, %v2692_v32 }
 0x298   : > { %v2624_v45 = vpop.f32.mrf.mxu1  ;;  %v4224_v30 = vpop.f32.mrf.mxu0 }
 0x299   : > { %v2693_v29 = vadd.f32 %v2624_v45, %v5597_v10 }
 0x29a   : > { %v4187_v53 = vpop.f32.mrf.mxu1  ;;  %v2807_v40 = vpop.f32.mrf.mxu0 }
 0x29b   : > { %v5657_v50 = vadd.f32 %v2807_v40, %v2693_v29 }
 0x29c   : > { %v2629_v48 = vpop.f32.mrf.mxu1  ;;  %v4225_v20 = vpop.f32.mrf.mxu0 }
 0x29d   : > { %v2694_v12 = vadd.f32 %v2629_v48, %v5604_v36 }
 0x29e   : > { %v4190_v41 = vpop.f32.mrf.mxu1  ;;  %v2812_v49 = vpop.f32.mrf.mxu0 }
 0x29f   : > { %v5660_v31 = vadd.f32 %v2812_v49, %v2694_v12 }
 0x2a0   : > { %v2632_v8 = vpop.f32.mrf.mxu1  ;;  %v4228_v17 = vpop.f32.mrf.mxu0 }
 0x2a1   : > { %v2695_v28 = vadd.f32 %v2632_v8, %v5607_v35 }
 0x2a2   : > { %v4191_v24 = vpop.f32.mrf.mxu1  ;;  %v2815_v14 = vpop.f32.mrf.mxu0 }
 0x2a3   : > { %v5663_v21 = vadd.f32 %v2815_v14, %v2695_v28 }
 0x2a4   : > { %v2637_v10 = vpop.f32.mrf.mxu1  ;;  %v4229_v23 = vpop.f32.mrf.mxu0 }
 0x2a5   : > { %v2696_v0 = vadd.f32 %v2637_v10, %v5612_v2 }
 0x2a6   : > { %v4194_v16 = vpop.f32.mrf.mxu1  ;;  %v2820_v38 = vpop.f32.mrf.mxu0 }
 0x2a7   : > { %v5666_v6 = vadd.f32 %v2820_v38, %v2696_v0 }
 0x2a8   : > { %v2640_v36 = vpop.f32.mrf.mxu1  ;;  %v4232_v25 = vpop.f32.mrf.mxu0 }
 0x2a9   : > { %v2697_v42 = vadd.f32 %v2640_v36, %v5615_v46 }
 0x2aa   : > { %v4195_v47 = vpop.f32.mrf.mxu1  ;;  %v2823_v13 = vpop.f32.mrf.mxu0 }
 0x2ab   : > { %v5669_v7 = vadd.f32 %v2823_v13, %v2697_v42 }
 0x2ac   : > { %v2645_v35 = vpop.f32.mrf.mxu1  ;;  %v4233_v37 = vpop.f32.mrf.mxu0 }
 0x2ad   : > { %v2698_v33 = vadd.f32 %v2645_v35, %v5618_v55 }
 0x2ae   : > { %v4198_v27 = vpop.f32.mrf.mxu1  ;;  %v2828_v39 = vpop.f32.mrf.mxu0 }
 0x2af   : > { %v5672_v4 = vadd.f32 %v2828_v39, %v2698_v33 }
 0x2b0   : > { %v2648_v2 = vpop.f32.mrf.mxu1  ;;  %v4236_v54 = vpop.f32.mrf.mxu0 }
 0x2b1   : > { %v2699_v63 = vadd.f32 %v2648_v2, %v5621_v1 }
 0x2b2   : > { %v4199_v18 = vpop.f32.mrf.mxu1  ;;  %v2831_v51 = vpop.f32.mrf.mxu0 }
 0x2b3   : > { %v5675_v3 = vadd.f32 %v2831_v51, %v2699_v63 }
 0x2b4   : > { %v2653_v46 = vpop.f32.mrf.mxu1  ;;  %v4237_v26 = vpop.f32.mrf.mxu0 }
 0x2b5   : > { %v2700_v62 = vadd.f32 %v2653_v46, %v5624_v52 }
 0x2b6   : > { %v4202_v22 = vpop.f32.mrf.mxu1  ;;  %v2836_v15 = vpop.f32.mrf.mxu0 }
 0x2b7   : > { %v5678_v32 = vadd.f32 %v2836_v15, %v2700_v62 }
 0x2b8   : > { %v2656_v55 = vpop.f32.mrf.mxu1  ;;  %v4240_v9 = vpop.f32.mrf.mxu0 }
 0x2b9   : > { %v2701_v11 = vadd.f32 %v2656_v55, %v5627_v59 }
 0x2ba   : > { %v4203_v45 = vpop.f32.mrf.mxu1  ;;  %v2839_v30 = vpop.f32.mrf.mxu0 }
 0x2bb   : > { %v5681_v29 = vadd.f32 %v2839_v30, %v2701_v11 }
 0x2bc   : > { %v2661_v1 = vpop.f32.mrf.mxu1  ;;  %v4241_v53 = vpop.f32.mrf.mxu0 }
 0x2bd   : > { %v2702_v40 = vadd.f32 %v2661_v1, %v5630_v58 }
 0x2be   : > { %v4206_v48 = vpop.f32.mrf.mxu1  ;;  %v2844_v20 = vpop.f32.mrf.mxu0 }
 0x2bf   : > { %v5684_v12 = vadd.f32 %v2844_v20, %v2702_v40 }
 0x2c0   : > { %v2664_v52 = vpop.f32.mrf.mxu1  ;;  %v4244_v41 = vpop.f32.mrf.mxu0 }
 0x2c1   : > { %v2703_v49 = vadd.f32 %v2664_v52, %v5633_v61 }
 0x2c2   : > { %v4207_v8 = vpop.f32.mrf.mxu1  ;;  %v2847_v17 = vpop.f32.mrf.mxu0 }
 0x2c3   : > { %v5687_v28 = vadd.f32 %v2847_v17, %v2703_v49 }
 0x2c4   : > { %v2669_v59 = vpop.f32.mrf.mxu1  ;;  %v4245_v24 = vpop.f32.mrf.mxu0 }
 0x2c5   : > { %v2704_v14 = vadd.f32 %v2669_v59, %v5636_v60 }
 0x2c6   : > { %v4210_v10 = vpop.f32.mrf.mxu1  ;;  %v2852_v23 = vpop.f32.mrf.mxu0 }
 0x2c7   : > { %v5690_v0 = vadd.f32 %v2852_v23, %v2704_v14 }
 0x2c8   : > { %v2672_v58 = vpop.f32.mrf.mxu1  ;;  %v4248_v16 = vpop.f32.mrf.mxu0 }
 0x2c9   : > { %v2705_v38 = vadd.f32 %v2672_v58, %v5639_v43 }
 0x2ca   : > { %v4211_v36 = vpop.f32.mrf.mxu1  ;;  %v2855_v25 = vpop.f32.mrf.mxu0 }
 0x2cb   : > { %v5693_v42 = vadd.f32 %v2855_v25, %v2705_v38 }
 0x2cc   : > { %v2677_v61 = vpop.f32.mrf.mxu1  ;;  %v4249_v47 = vpop.f32.mrf.mxu0 }
 0x2cd   : > { %v2706_v13 = vadd.f32 %v2677_v61, %v5642_v57 }
 0x2ce   : > { %v4214_v35 = vpop.f32.mrf.mxu1  ;;  %v2860_v37 = vpop.f32.mrf.mxu0 }
 0x2cf   : > { %v5696_v33 = vadd.f32 %v2860_v37, %v2706_v13 }
 0x2d0   : > { %v2680_v60 = vpop.f32.mrf.mxu1  ;;  %v4252_v27 = vpop.f32.mrf.mxu0 }
 0x2d1   : > { %v2707_v39 = vadd.f32 %v2680_v60, %v5645_v56 }
 0x2d2   : > { %v4215_v2 = vpop.f32.mrf.mxu1  ;;  %v2863_v54 = vpop.f32.mrf.mxu0 }
 0x2d3   : > { %v5699_v63 = vadd.f32 %v2863_v54, %v2707_v39 }
 0x2d4   : > { %v2685_v43 = vpop.f32.mrf.mxu1  ;;  %v4253_v18 = vpop.f32.mrf.mxu0 }
 0x2d5   : > { %v2708_v51 = vadd.f32 %v2685_v43, %v5648_v19  ;;  %v5711_v19 = vld [vmem:[%s5859_s5] ss:$0 sm:$0xff] }
 0x2d6   : > { %v4218_v46 = vpop.f32.mrf.mxu1  ;;  %v2868_v26 = vpop.f32.mrf.mxu0 }
 0x2d7   : > { %v5702_v62 = vadd.f32 %v2868_v26, %v2708_v51 }
 0x2d8   : > { %v2688_v57 = vpop.f32.mrf.mxu1  ;;  %v4256_v22 = vpop.f32.mrf.mxu0 }
 0x2d9   : > { %v2709_v15 = vadd.f32 %v2688_v57, %v5651_v44 }
 0x2da   : > { %v4219_v55 = vpop.f32.mrf.mxu1  ;;  %v2871_v9 = vpop.f32.mrf.mxu0 }
 0x2db   : > { %v5705_v11 = vadd.f32 %v2871_v9, %v2709_v15 }
 0x2dc   : > { %v4257_v56 = vpop.f32.mrf.mxu0  ;;  %v3017_v45 = vpop.f32.mrf.mxu1 }
 0x2dd   : > { %v3088_v30 = vadd.f32 %v3017_v45, %v5654_v5 }
 0x2de   : > { %v4262_v1 = vpop.f32.mrf.mxu1 }
 0x2df   : > { %v3113_v40 = vadd.f32 %v5711_v19, %v3088_v30 }
 0x2e0   : > { %v3020_v53 = vpop.f32.mrf.mxu1 }
 0x2e1   : > { %v3089_v48 = vadd.f32 %v3020_v53, %v5657_v50  ;;  %v3131_v41 = vmax.f32 %v3113_v40, 0.0 }
 0x2e2   : > { %v4263_v44 = vpop.f32.mrf.mxu1 }
 0x2e3   : > { %v3114_v20 = vadd.f32 %v5711_v19, %v3089_v48 }
 0x2e4   : > { %v3025_v52 = vpop.f32.mrf.mxu1 }
 0x2e5   : > { %v3132_v49 = vmax.f32 %v3114_v20, 0.0  ;;  %v3090_v8 = vadd.f32 %v3025_v52, %v5660_v31 }
 0x2e6   : > { %v4266_v5 = vpop.f32.mrf.mxu1 }
 0x2e7   : > { %v3149_v17 = vpack.c.bf16 %v3132_v49, %v3131_v41  ;;  %v3115_v24 = vadd.f32 %v5711_v19, %v3090_v8 }
 0x2e8   : > { %v3028_v59 = vpop.f32.mrf.mxu1 }
 0x2e9   : > { %v3091_v14 = vadd.f32 %v3028_v59, %v5663_v21  ;;  %4299 = vmatmul.mubr.msk.bf16.vlgmr.msra.gmra.mxu0 %vm1120_vm4, %v3149_v17  ;;  %v3133_v58 = vmax.f32 %v3115_v24, 0.0 }
 0x2ea   : > { %v4267_v10 = vpop.f32.mrf.mxu1  ;;  %4302 = vmatprep.mubr.msk.bf16.mxu0 %vm4492_vm1, %v5899_v34 }
 0x2eb   : > { %v3116_v50 = vadd.f32 %v5711_v19, %v3091_v14 }
 0x2ec   : > { %v3033_v23 = vpop.f32.mrf.mxu1 }
 0x2ed   : > { %v3134_v16 = vmax.f32 %v3116_v50, 0.0  ;;  %v3092_v31 = vadd.f32 %v3033_v23, %v5666_v6 }
 0x2ee   : > { %v4270_v38 = vpop.f32.mrf.mxu1 }
 0x2ef   : > { %v3150_v36 = vpack.c.bf16 %v3134_v16, %v3133_v58  ;;  %v3117_v61 = vadd.f32 %v5711_v19, %v3092_v31 }
 0x2f0   : > { %v3036_v25 = vpop.f32.mrf.mxu1 }
 0x2f1   : > { %v3093_v21 = vadd.f32 %v3036_v25, %v5669_v7  ;;  %4303 = vmatmul.mubr.msk.bf16.gmra.mxu0 %vm1120_vm4, %v3150_v36  ;;  %v3135_v37 = vmax.f32 %v3117_v61, 0.0 }
 0x2f2   : > { %v4271_v47 = vpop.f32.mrf.mxu1  ;;  %4306 = vmatprep.mubr.msk.bf16.mxu0 %vm4492_vm1, %v5899_v34 }
 0x2f3   : > { %v3118_v13 = vadd.f32 %v5711_v19, %v3093_v21 }
 0x2f4   : > { %v3041_v35 = vpop.f32.mrf.mxu1 }
 0x2f5   : > { %v3136_v60 = vmax.f32 %v3118_v13, 0.0  ;;  %v3094_v6 = vadd.f32 %v3041_v35, %v5672_v4 }
 0x2f6   : > { %v4274_v27 = vpop.f32.mrf.mxu1 }
 0x2f7   : > { %v3151_v39 = vpack.c.bf16 %v3136_v60, %v3135_v37  ;;  %v3119_v54 = vadd.f32 %v5711_v19, %v3094_v6 }
 0x2f8   : > { %v3044_v2 = vpop.f32.mrf.mxu1 }
 0x2f9   : > { %v3095_v7 = vadd.f32 %v3044_v2, %v5675_v3  ;;  %4307 = vmatmul.mubr.msk.bf16.gmra.mxu0 %vm1120_vm4, %v3151_v39  ;;  %v3137_v46 = vmax.f32 %v3119_v54, 0.0 }
 0x2fa   : > { %v4275_v43 = vpop.f32.mrf.mxu1  ;;  %4310 = vmatprep.mubr.msk.bf16.mxu0 %vm4492_vm1, %v5899_v34 }
 0x2fb   : > { %v3120_v18 = vadd.f32 %v5711_v19, %v3095_v7 }
 0x2fc   : > { %v3049_v51 = vpop.f32.mrf.mxu1 }
 0x2fd   : > { %v3138_v26 = vmax.f32 %v3120_v18, 0.0  ;;  %v3096_v4 = vadd.f32 %v3049_v51, %v5678_v32 }
 0x2fe   : > { %v4278_v57 = vpop.f32.mrf.mxu1 }
 0x2ff   : > { %v3152_v22 = vpack.c.bf16 %v3138_v26, %v3137_v46  ;;  %v3121_v55 = vadd.f32 %v5711_v19, %v3096_v4 }
 0x300   : > { %v3052_v15 = vpop.f32.mrf.mxu1 }
 0x301   : > { %v3097_v3 = vadd.f32 %v3052_v15, %v5681_v29  ;;  %4311 = vmatmul.mubr.msk.bf16.gmra.mxu0 %vm1120_vm4, %v3152_v22  ;;  %v3139_v30 = vmax.f32 %v3121_v55, 0.0 }
 0x302   : > { %v4279_v9 = vpop.f32.mrf.mxu1  ;;  %4314 = vmatprep.mubr.msk.bf16.mxu0 %vm4492_vm1, %v5899_v34 }
 0x303   : > { %v3122_v56 = vadd.f32 %v5711_v19, %v3097_v3 }
 0x304   : > { %v3057_v45 = vpop.f32.mrf.mxu1 }
 0x305   : > { %v3140_v1 = vmax.f32 %v3122_v56, 0.0  ;;  %v3098_v32 = vadd.f32 %v3057_v45, %v5684_v12 }
 0x306   : > { %v4282_v53 = vpop.f32.mrf.mxu1 }
 0x307   : > { %v3153_v40 = vpack.c.bf16 %v3140_v1, %v3139_v30  ;;  %v3123_v44 = vadd.f32 %v5711_v19, %v3098_v32 }
 0x308   : > { %v3060_v48 = vpop.f32.mrf.mxu1 }
 0x309   : > { %v3099_v29 = vadd.f32 %v3060_v48, %v5687_v28  ;;  %4315 = vmatmul.mubr.msk.bf16.gmra.mxu0 %vm1120_vm4, %v3153_v40  ;;  %v3141_v49 = vmax.f32 %v3123_v44, 0.0 }
 0x30a   : > { %v4283_v20 = vpop.f32.mrf.mxu1  ;;  %4318 = vmatprep.mubr.msk.bf16.mxu0 %vm4492_vm1, %v5899_v34 }
 0x30b   : > { %v3124_v52 = vadd.f32 %v5711_v19, %v3099_v29 }
 0x30c   : > { %v3065_v41 = vpop.f32.mrf.mxu1 }
 0x30d   : > { %v3142_v8 = vmax.f32 %v3124_v52, 0.0  ;;  %v3100_v12 = vadd.f32 %v3065_v41, %v5690_v0 }
 0x30e   : > { %v4286_v5 = vpop.f32.mrf.mxu1 }
 0x30f   : > { %v3154_v17 = vpack.c.bf16 %v3142_v8, %v3141_v49  ;;  %v3125_v24 = vadd.f32 %v5711_v19, %v3100_v12 }
 0x310   : > { %v3068_v59 = vpop.f32.mrf.mxu1 }
 0x311   : > { %v3101_v28 = vadd.f32 %v3068_v59, %v5693_v42  ;;  %4319 = vmatmul.mubr.msk.bf16.gmra.mxu0 %vm1120_vm4, %v3154_v17  ;;  %v3143_v23 = vmax.f32 %v3125_v24, 0.0 }
 0x312   : > { %v4287_v14 = vpop.f32.mrf.mxu1  ;;  %4322 = vmatprep.mubr.msk.bf16.mxu0 %vm4492_vm1, %v5899_v34 }
 0x313   : > { %v3126_v10 = vadd.f32 %v5711_v19, %v3101_v28 }
 0x314   : > { %v3073_v50 = vpop.f32.mrf.mxu1 }
 0x315   : > { %v3144_v58 = vmax.f32 %v3126_v10, 0.0  ;;  %v3102_v0 = vadd.f32 %v3073_v50, %v5696_v33 }
 0x316   : > { %v4290_v16 = vpop.f32.mrf.mxu1 }
 0x317   : > { %v3155_v31 = vpack.c.bf16 %v3144_v58, %v3143_v23  ;;  %v3127_v36 = vadd.f32 %v5711_v19, %v3102_v0 }
 0x318   : > { %v3076_v38 = vpop.f32.mrf.mxu1 }
 0x319   : > { %v3103_v42 = vadd.f32 %v3076_v38, %v5699_v63  ;;  %4323 = vmatmul.mubr.msk.bf16.gmra.mxu0 %vm1120_vm4, %v3155_v31  ;;  %v3145_v47 = vmax.f32 %v3127_v36, 0.0 }
 0x31a   : > { %v4291_v25 = vpop.f32.mrf.mxu1  ;;  %4326 = vmatprep.mubr.msk.bf16.mxu0 %vm4492_vm1, %v5899_v34 }
 0x31b   : > { %v3128_v61 = vadd.f32 %v5711_v19, %v3103_v42 }
 0x31c   : > { %v3081_v21 = vpop.f32.mrf.mxu1 }
 0x31d   : > { %v3146_v13 = vmax.f32 %v3128_v61, 0.0  ;;  %v3104_v33 = vadd.f32 %v3081_v21, %v5702_v62  ;;  %v5778_v62 = vld [vmem:[%s5861_s7] ss:$0 sm:$0xff] }
 0x31e   : > { %v4294_v35 = vpop.f32.mrf.mxu1 }
 0x31f   : > { %v3156_v37 = vpack.c.bf16 %v3146_v13, %v3145_v47  ;;  %v3129_v60 = vadd.f32 %v5711_v19, %v3104_v33 }
 0x320   : > { %v3084_v63 = vpop.f32.mrf.mxu1 }
 0x321   : > { %v3105_v6 = vadd.f32 %v3084_v63, %v5705_v11  ;;  %4327 = vmatmul.mubr.msk.bf16.gmra.mxu0 %vm1120_vm4, %v3156_v37  ;;  %v3147_v2 = vmax.f32 %v3129_v60, 0.0 }
 0x322   : > { %v4295_v27 = vpop.f32.mrf.mxu1  ;;  %4330 = vmatprep.mubr.msk.bf16.mxu0 %vm4492_vm1, %v5899_v34 }
 0x323   : > { %v3130_v39 = vadd.f32 %v5711_v19, %v3105_v6 }
 0x325   : > { %v3148_v54 = vmax.f32 %v3130_v39, 0.0 }
 0x327   : > { %v3157_v7 = vpack.c.bf16 %v3148_v54, %v3147_v2 }
 0x329   : > { %4331 = vmatmul.mubr.msk.bf16.gmra.mxu0 %vm1120_vm4, %v3157_v7 }
 0x3a9   : > { %v3234_v11 = vpop.f32.mrf.mxu0 }
 0x3aa   : > { %v3235_v43 = vadd.f32 %v5778_v62, %v3234_v11 }
 0x3ab   : > { %v4300_v34 = vpop.f32.mrf.mxu0 }
 0x3ac   : > { %v3305_v18 = vmax.f32 %v3235_v43, 0.0 }
 0x3ad   : > { %v3237_v19 = vpop.f32.mrf.mxu0 }
 0x3ae   : > { %v3788_v51 = vpack.c.bf16 %v3305_v18, %v3305_v18  ;;  %v3238_v46 = vadd.f32 %v5778_v62, %v3237_v19 }
 0x3af   : > { %v4301_v26 = vpop.f32.mrf.mxu0 }
 0x3b0   : > { %3396 = vst.msk [vmem:[%s5784_s14] sm:$0xf] %vm3395_vm11, %v3788_v51  ;;  %v3306_v4 = vmax.f32 %v3238_v46, 0.0 }
 0x3b1   : > { %v3242_v57 = vpop.f32.mrf.mxu0 }
 0x3b2   : > { %v3789_v22 = vpack.c.bf16 %v3306_v4, %v3306_v4  ;;  %v3243_v15 = vadd.f32 %v5778_v62, %v3242_v57 }
 0x3b3   : > { %v4304_v55 = vpop.f32.mrf.mxu0 }
 0x3b4   : > { %3397 = vst.msk [vmem:[%s5784_s14 + $0x4] sm:$0xf] %vm3395_vm11, %v3789_v22  ;;  %v3307_v3 = vmax.f32 %v3243_v15, 0.0 }
 0x3b5   : > { %v3245_v9 = vpop.f32.mrf.mxu0 }
 0x3b6   : > { %v3790_v56 = vpack.c.bf16 %v3307_v3, %v3307_v3  ;;  %v3246_v45 = vadd.f32 %v5778_v62, %v3245_v9 }
 0x3b7   : > { %v4305_v30 = vpop.f32.mrf.mxu0 }
 0x3b8   : > { %3398 = vst.msk [vmem:[%s5784_s14 + $0x8] sm:$0xf] %vm3395_vm11, %v3790_v56  ;;  %v3308_v1 = vmax.f32 %v3246_v45, 0.0 }
 0x3b9   : > { %v3250_v32 = vpop.f32.mrf.mxu0 }
 0x3ba   : > { %v3791_v53 = vpack.c.bf16 %v3308_v1, %v3308_v1  ;;  %v3251_v40 = vadd.f32 %v5778_v62, %v3250_v32 }
 0x3bb   : > { %v4308_v48 = vpop.f32.mrf.mxu0 }
 0x3bc   : > { %3399 = vst.msk [vmem:[%s5784_s14 + $0xc] sm:$0xf] %vm3395_vm11, %v3791_v53  ;;  %v3309_v44 = vmax.f32 %v3251_v40, 0.0 }
 0x3bd   : > { %v3253_v29 = vpop.f32.mrf.mxu0 }
 0x3be   : > { %v3792_v20 = vpack.c.bf16 %v3309_v44, %v3309_v44  ;;  %v3254_v52 = vadd.f32 %v5778_v62, %v3253_v29 }
 0x3bf   : > { %v4309_v41 = vpop.f32.mrf.mxu0 }
 0x3c0   : > { %3400 = vst.msk [vmem:[%s5784_s14 + $0x10] sm:$0xf] %vm3395_vm11, %v3792_v20  ;;  %v3310_v49 = vmax.f32 %v3254_v52, 0.0 }
 0x3c1   : > { %v3258_v8 = vpop.f32.mrf.mxu0 }
 0x3c2   : > { %v3793_v12 = vpack.c.bf16 %v3310_v49, %v3310_v49  ;;  %v3259_v5 = vadd.f32 %v5778_v62, %v3258_v8 }
 0x3c3   : > { %v4312_v17 = vpop.f32.mrf.mxu0 }
 0x3c4   : > { %3401 = vst.msk [vmem:[%s5784_s14 + $0x14] sm:$0xf] %vm3395_vm11, %v3793_v12  ;;  %v3311_v59 = vmax.f32 %v3259_v5, 0.0 }
 0x3c5   : > { %v3261_v24 = vpop.f32.mrf.mxu0 }
 0x3c6   : > { %v3794_v28 = vpack.c.bf16 %v3311_v59, %v3311_v59  ;;  %v3262_v14 = vadd.f32 %v5778_v62, %v3261_v24 }
 0x3c7   : > { %v4313_v10 = vpop.f32.mrf.mxu0 }
 0x3c8   : > { %3402 = vst.msk [vmem:[%s5784_s14 + $0x18] sm:$0xf] %vm3395_vm11, %v3794_v28  ;;  %v3312_v50 = vmax.f32 %v3262_v14, 0.0 }
 0x3c9   : > { %v3266_v23 = vpop.f32.mrf.mxu0 }
 0x3ca   : > { %v3795_v58 = vpack.c.bf16 %v3312_v50, %v3312_v50  ;;  %v3267_v0 = vadd.f32 %v5778_v62, %v3266_v23 }
 0x3cb   : > { %v4316_v16 = vpop.f32.mrf.mxu0 }
 0x3cc   : > { %3403 = vst.msk [vmem:[%s5784_s14 + $0x1c] sm:$0xf] %vm3395_vm11, %v3795_v58  ;;  %v3313_v31 = vmax.f32 %v3267_v0, 0.0 }
 0x3cd   : > { %v3269_v38 = vpop.f32.mrf.mxu0 }
 0x3ce   : > { %v3796_v36 = vpack.c.bf16 %v3313_v31, %v3313_v31  ;;  %v3270_v42 = vadd.f32 %v5778_v62, %v3269_v38 }
 0x3cf   : > { %v4317_v25 = vpop.f32.mrf.mxu0 }
 0x3d0   : > { %3404 = vst.msk [vmem:[%s5784_s14 + $0x20] sm:$0xf] %vm3395_vm11, %v3796_v36  ;;  %v3314_v61 = vmax.f32 %v3270_v42, 0.0 }
 0x3d1   : > { %v3274_v21 = vpop.f32.mrf.mxu0 }
 0x3d2   : > { %v3797_v47 = vpack.c.bf16 %v3314_v61, %v3314_v61  ;;  %v3275_v13 = vadd.f32 %v5778_v62, %v3274_v21 }
 0x3d3   : > { %v4320_v33 = vpop.f32.mrf.mxu0 }
 0x3d4   : > { %3405 = vst.msk [vmem:[%s5784_s14 + $0x24] sm:$0xf] %vm3395_vm11, %v3797_v47  ;;  %v3315_v35 = vmax.f32 %v3275_v13, 0.0 }
 0x3d5   : > { %v3277_v37 = vpop.f32.mrf.mxu0 }
 0x3d6   : > { %v3798_v60 = vpack.c.bf16 %v3315_v35, %v3315_v35  ;;  %v3278_v63 = vadd.f32 %v5778_v62, %v3277_v37 }
 0x3d7   : > { %v4321_v6 = vpop.f32.mrf.mxu0 }
 0x3d8   : > { %3406 = vst.msk [vmem:[%s5784_s14 + $0x28] sm:$0xf] %vm3395_vm11, %v3798_v60  ;;  %v3316_v27 = vmax.f32 %v3278_v63, 0.0 }
 0x3d9   : > { %v3282_v39 = vpop.f32.mrf.mxu0 }
 0x3da   : > { %v3799_v2 = vpack.c.bf16 %v3316_v27, %v3316_v27  ;;  %v3283_v54 = vadd.f32 %v5778_v62, %v3282_v39 }
 0x3db   : > { %v4324_v7 = vpop.f32.mrf.mxu0 }
 0x3dc   : > { %3407 = vst.msk [vmem:[%s5784_s14 + $0x2c] sm:$0xf] %vm3395_vm11, %v3799_v2  ;;  %v3317_v11 = vmax.f32 %v3283_v54, 0.0 }
 0x3dd   : > { %v3285_v43 = vpop.f32.mrf.mxu0 }
 0x3de   : > { %v3800_v34 = vpack.c.bf16 %v3317_v11, %v3317_v11  ;;  %v3286_v18 = vadd.f32 %v5778_v62, %v3285_v43 }
 0x3df   : > { %v4325_v19 = vpop.f32.mrf.mxu0 }
 0x3e0   : > { %3408 = vst.msk [vmem:[%s5784_s14 + $0x30] sm:$0xf] %vm3395_vm11, %v3800_v34  ;;  %v3318_v51 = vmax.f32 %v3286_v18, 0.0 }
 0x3e1   : > { %v3290_v46 = vpop.f32.mrf.mxu0 }
 0x3e2   : > { %v3801_v26 = vpack.c.bf16 %v3318_v51, %v3318_v51  ;;  %v3291_v4 = vadd.f32 %v5778_v62, %v3290_v46 }
 0x3e3   : > { %v4328_v57 = vpop.f32.mrf.mxu0 }
 0x3e4   : > { %3409 = vst.msk [vmem:[%s5784_s14 + $0x34] sm:$0xf] %vm3395_vm11, %v3801_v26  ;;  %v3319_v22 = vmax.f32 %v3291_v4, 0.0 }
 0x3e5   : > { %v3293_v15 = vpop.f32.mrf.mxu0 }
 0x3e6   : > { %v3802_v55 = vpack.c.bf16 %v3319_v22, %v3319_v22  ;;  %v3294_v3 = vadd.f32 %v5778_v62, %v3293_v15 }
 0x3e7   : > { %v4329_v9 = vpop.f32.mrf.mxu0 }
 0x3e8   : > { %3410 = vst.msk [vmem:[%s5784_s14 + $0x38] sm:$0xf] %vm3395_vm11, %v3802_v55  ;;  %v3320_v56 = vmax.f32 %v3294_v3, 0.0 }
 0x3e9   : > { %v3298_v45 = vpop.f32.mrf.mxu0 }
 0x3ea   : > { %v3803_v30 = vpack.c.bf16 %v3320_v56, %v3320_v56  ;;  %v3299_v1 = vadd.f32 %v5778_v62, %v3298_v45 }
 0x3eb   : > { %v4332_v32 = vpop.f32.mrf.mxu0 }
 0x3ec   : > { %3411 = vst.msk [vmem:[%s5784_s14 + $0x3c] sm:$0xf] %vm3395_vm11, %v3803_v30  ;;  %v3321_v53 = vmax.f32 %v3299_v1, 0.0 }
 0x3ed   : > { %v3301_v40 = vpop.f32.mrf.mxu0 }
 0x3ee   : > { %v3804_v48 = vpack.c.bf16 %v3321_v53, %v3321_v53  ;;  %v3302_v44 = vadd.f32 %v5778_v62, %v3301_v40 }
 0x3ef   : > { %v4333_v29 = vpop.f32.mrf.mxu0 }
 0x3f0   : > { %3412 = vst.msk [vmem:[%s5784_s14 + $0x40] sm:$0xf] %vm3395_vm11, %v3804_v48  ;;  %v3322_v20 = vmax.f32 %v3302_v44, 0.0 }
 0x3f2   : > { %v3805_v52 = vpack.c.bf16 %v3322_v20, %v3322_v20 }
 0x3f4   : > { %3413 = vst.msk [vmem:[%s5784_s14 + $0x44] sm:$0xf] %vm3395_vm11, %v3805_v52 }
 0x3f5 PF: > { %s18_s9 = sadd.s32 1, %s4488_s9   ;;  %s5939_s27 = smov %s4480_s29 }
 0x3f6   : > { %p15_p7 = scmp.ge.s32.totalorder %s18_s9, 6   ;;  %s5940_s28 = smov %s4484_s30 }
 0x3f7   : > { %s5941_s29 = smov %s5944_s10  ;;  %s5942_s30 = smov %s5948_s11 }
 0x3f8   :  { %17 = sbr.rel (!%p15_p7) target bundleno = 3 (0x3), region = 93 }

</bundles_post_ra>
